<compile_context>
chip_gen: v6e
topology: v6e:2x2x1
jax: 0.10.0
libtpu: 0.0.40
codegen_flags: <defaults>
</compile_context>

<pallas_src>
import jax
import jax.numpy as jnp
from jax.experimental import pallas as pl
from jax.experimental.pallas import tpu as pltpu


OUT_PAD = 128  # lane-dense padding for the final Linear(F, 1) output column


# ------------------------------ fused kernel ---------------------------------
def _make_fused_kernel(num_layers, seq_len, batch_pad, hidden):
    T, Bp, H = seq_len, batch_pad, hidden
    n_in = 2 + 3 * num_layers + 9  # x, eng, per-layer (Wih, Whh, b), 9 head params

    def kernel(*refs):
        x_ref, eng_ref = refs[0], refs[1]
        lstm_refs = refs[2:2 + 3 * num_layers]
        (we1_ref, be1_ref, we2_ref, be2_ref,
         wc1s_ref, wc1e_ref, bc1_ref, wc2_ref, bc2_ref) = refs[2 + 3 * num_layers:n_in]
        out_ref = refs[n_in]
        gx_sc = refs[n_in + 1]     # (T*Bp, 4H) per-layer input-gate precompute (reused)
        hseq_sc = refs[n_in + 2]   # (T*Bp, H) hidden sequence feeding the next layer

        def lstm_cell(gates, c_prev):
            # Two full-width (Bp, 4H) transcendentals, then slice i/f/g/o.
            sig = jax.nn.sigmoid(gates)
            tnh = jnp.tanh(gates)
            i = sig[:, 0 * H:1 * H]
            f = sig[:, 1 * H:2 * H]
            o = sig[:, 3 * H:4 * H]
            g = tnh[:, 2 * H:3 * H]
            c = f * c_prev + i * g
            h = o * jnp.tanh(c)
            return h, c

        seq_rep = None
        for layer in range(num_layers):
            wih = lstm_refs[3 * layer][...]       # (D_in or H, 4H)
            whh = lstm_refs[3 * layer + 1][...]   # (H, 4H)
            b = lstm_refs[3 * layer + 2][...]     # (1, 4H), b_ih + b_hh

            layer_in = x_ref[...] if layer == 0 else hseq_sc[...]
            # Hoisted input projection: one (T*Bp, D) @ (D, 4H) matmul + bias.
            gx_sc[...] = jnp.dot(layer_in, wih,
                                 preferred_element_type=jnp.float32) + b

            is_last = layer == num_layers - 1

            def body(t, carry, _whh=whh, _is_last=is_last):
                h, c = carry
                row = pl.multiple_of(t * Bp, Bp)
                gates = gx_sc[pl.ds(row, Bp), :] + jnp.dot(
                    h, _whh, preferred_element_type=jnp.float32)
                h, c = lstm_cell(gates, c)
                if not _is_last:
                    hseq_sc[pl.ds(row, Bp), :] = h
                return (h, c)

            init = (jnp.zeros((Bp, H), jnp.float32),
                    jnp.zeros((Bp, H), jnp.float32))
            h_final, _ = jax.lax.fori_loop(0, T, body, init, unroll=True)
            seq_rep = h_final  # hn[-1] of this layer; last layer's is the seq rep

        # ------------------------------ MLP head ------------------------------
        eng = eng_ref[...]
        h1 = jnp.maximum(
            jnp.dot(eng, we1_ref[...], preferred_element_type=jnp.float32)
            + be1_ref[...], 0.0)
        eng_rep = jnp.maximum(
            jnp.dot(h1, we2_ref[...], preferred_element_type=jnp.float32)
            + be2_ref[...], 0.0)
        # concat(seq_rep, eng_rep) @ Wc1 == seq_rep @ Wc1[:H] + eng_rep @ Wc1[H:]
        pre = (jnp.dot(seq_rep, wc1s_ref[...], preferred_element_type=jnp.float32)
               + jnp.dot(eng_rep, wc1e_ref[...], preferred_element_type=jnp.float32)
               + bc1_ref[...])
        # TODO(synk): PyTorch module only *logs* pre-activation mean/std here; logging skipped.
        h2 = jnp.maximum(pre, 0.0)
        logit = (jnp.dot(h2, wc2_ref[...], preferred_element_type=jnp.float32)
                 + bc2_ref[...])
        out_ref[...] = jax.nn.sigmoid(logit)

    return kernel


# ------------------------------ parameter setup ------------------------------
def _uniform(key, shape, bound):
    return jax.random.uniform(key, shape, jnp.float32, -bound, bound)


def init_params(key, seq_input_dim, seq_hidden_dim, seq_num_layers,
                eng_input_dim, fc_hidden_dim):
    H = seq_hidden_dim
    params = {"lstm": []}
    k_lstm = 1.0 / jnp.sqrt(H)
    for layer in range(seq_num_layers):
        d_in = seq_input_dim if layer == 0 else H
        key, k1, k2, k3, k4 = jax.random.split(key, 5)
        w_ih = _uniform(k1, (4 * H, d_in), k_lstm)   # PyTorch layout (4H, D)
        w_hh = _uniform(k2, (4 * H, H), k_lstm)
        b_ih = _uniform(k3, (4 * H,), k_lstm)
        b_hh = _uniform(k4, (4 * H,), k_lstm)
        params["lstm"].append((w_ih.T, w_hh.T, (b_ih + b_hh)[None, :]))

    def linear(key, d_in, d_out):
        k = 1.0 / jnp.sqrt(d_in)
        kw, kb = jax.random.split(key)
        w = _uniform(kw, (d_out, d_in), k)  # PyTorch layout (out, in)
        b = _uniform(kb, (d_out,), k)
        return w.T, b[None, :]              # stored (in, out), (1, out)

    key, ke1, ke2, kc1, kc2 = jax.random.split(key, 5)
    we1, be1 = linear(ke1, eng_input_dim, fc_hidden_dim)
    we2, be2 = linear(ke2, fc_hidden_dim, fc_hidden_dim)
    wc1, bc1 = linear(kc1, H + fc_hidden_dim, fc_hidden_dim)
    wc2, bc2 = linear(kc2, fc_hidden_dim, 1)
    params["fc"] = (we1, be1, we2, be2, wc1[:H], wc1[H:], bc1, wc2, bc2)
    return params


# --------------------------------- forward -----------------------------------
def dual_input_forward(params, seq_input, eng_input):
    """seq_input: (B, T, seq_input_dim) batch_first; eng_input: (B, eng_input_dim)."""
    B, T, D = seq_input.shape
    L = len(params["lstm"])
    H = params["lstm"][0][1].shape[0]
    Bp = ((B + 7) // 8) * 8  # pad batch to sublane height (independent rows)

    # Time-major, batch-padded, flattened to (T*Bp, D) for the hoisted projection.
    x = jnp.transpose(seq_input, (1, 0, 2))                    # (T, B, D)
    x = jnp.pad(x, ((0, 0), (0, Bp - B), (0, 0)))
    x_flat = x.reshape(T * Bp, D)
    eng = jnp.pad(eng_input, ((0, Bp - B), (0, 0)))

    lstm_flat = []
    for (w_ih_t, w_hh_t, b) in params["lstm"]:
        lstm_flat += [w_ih_t, w_hh_t, b]
    (we1, be1, we2, be2, wc1s, wc1e, bc1, wc2, bc2) = params["fc"]

    # Lane-dense final output: pad Linear(F, 1) to 128 output columns.
    wc2_p = jnp.pad(wc2, ((0, 0), (0, OUT_PAD - wc2.shape[1])))
    bc2_p = jnp.pad(bc2, ((0, 0), (0, OUT_PAD - bc2.shape[1])))

    kernel = _make_fused_kernel(L, T, Bp, H)
    out_pad = pl.pallas_call(
        kernel,
        out_shape=jax.ShapeDtypeStruct((Bp, OUT_PAD), jnp.float32),
        scratch_shapes=[
            pltpu.VMEM((T * Bp, 4 * H), jnp.float32),  # per-layer gate precompute
            pltpu.VMEM((T * Bp, H), jnp.float32),      # hidden sequence for next layer
        ],
    )(x_flat, eng, *lstm_flat, we1, be1, we2, be2, wc1s, wc1e, bc1, wc2_p, bc2_p)
    return out_pad[:B, :1]


# -------------------------- pure-JAX reference check -------------------------
def _ref_forward(params, seq_input, eng_input):
    x = jnp.transpose(seq_input, (1, 0, 2))
    for (w_ih_t, w_hh_t, b) in params["lstm"]:
        H = w_hh_t.shape[0]
        B = x.shape[1]

        def step(carry, xt):
            h, c = carry
            gates = xt @ w_ih_t + h @ w_hh_t + b[0]
            i = jax.nn.sigmoid(gates[:, 0 * H:1 * H])
            f = jax.nn.sigmoid(gates[:, 1 * H:2 * H])
            g = jnp.tanh(gates[:, 2 * H:3 * H])
            o = jax.nn.sigmoid(gates[:, 3 * H:4 * H])
            c = f * c + i * g
            h = o * jnp.tanh(c)
            return (h, c), h

        (_, _), x = jax.lax.scan(step, (jnp.zeros((B, H)), jnp.zeros((B, H))), x)
    seq_rep = x[-1]
    (we1, be1, we2, be2, wc1s, wc1e, bc1, wc2, bc2) = params["fc"]
    eng_rep = jnp.maximum(jnp.maximum(eng_input @ we1 + be1, 0.0) @ we2 + be2, 0.0)
    h2 = jnp.maximum(seq_rep @ wc1s + eng_rep @ wc1e + bc1, 0.0)
    return jax.nn.sigmoid(h2 @ wc2 + bc2)


if __name__ == "__main__":
    B, T = 2, 8
    seq_input_dim, seq_hidden_dim, seq_num_layers = 4, 32, 2
    eng_input_dim, fc_hidden_dim = 8, 32

    key = jax.random.PRNGKey(0)
    key, k_seq, k_eng, k_par = jax.random.split(key, 4)
    seq_input = jax.random.normal(k_seq, (B, T, seq_input_dim), jnp.float32)
    eng_input = jax.random.normal(k_eng, (B, eng_input_dim), jnp.float32)
    params = init_params(k_par, seq_input_dim, seq_hidden_dim, seq_num_layers,
                         eng_input_dim, fc_hidden_dim)

    out = dual_input_forward(params, seq_input, eng_input)
    out = jax.block_until_ready(out)

    ref = _ref_forward(params, seq_input, eng_input)
    assert out.shape == (B, 1)
    assert jnp.allclose(out, ref, rtol=1e-5, atol=1e-5), (out, ref)

    print("KERNEL_OK")
</pallas_src>

<mosaic_0001>
module attributes {stable_mosaic.version = 11 : i64} {
  func.func @kernel(%arg0: memref<64x4xf32, #tpu.memory_space<vmem>>, %arg1: memref<8x8xf32, #tpu.memory_space<vmem>>, %arg2: memref<4x128xf32, #tpu.memory_space<vmem>>, %arg3: memref<32x128xf32, #tpu.memory_space<vmem>>, %arg4: memref<1x128xf32, #tpu.memory_space<vmem>>, %arg5: memref<32x128xf32, #tpu.memory_space<vmem>>, %arg6: memref<32x128xf32, #tpu.memory_space<vmem>>, %arg7: memref<1x128xf32, #tpu.memory_space<vmem>>, %arg8: memref<8x32xf32, #tpu.memory_space<vmem>>, %arg9: memref<1x32xf32, #tpu.memory_space<vmem>>, %arg10: memref<32x32xf32, #tpu.memory_space<vmem>>, %arg11: memref<1x32xf32, #tpu.memory_space<vmem>>, %arg12: memref<32x32xf32, #tpu.memory_space<vmem>>, %arg13: memref<32x32xf32, #tpu.memory_space<vmem>>, %arg14: memref<1x32xf32, #tpu.memory_space<vmem>>, %arg15: memref<32x128xf32, #tpu.memory_space<vmem>>, %arg16: memref<1x128xf32, #tpu.memory_space<vmem>>, %arg17: memref<8x128xf32, #tpu.memory_space<vmem>>, %arg18: memref<64x128xf32, #tpu.memory_space<vmem>>, %arg19: memref<64x32xf32, #tpu.memory_space<vmem>>) attributes {dimension_semantics = [], scalar_prefetch = 0 : i64, scratch_operands = 2 : i64, tpu.core_type = #tpu.core_type<tc>} {
    %c0 = arith.constant 0 : index
    %c0_0 = arith.constant 0 : index
    %0 = vector.load %arg2[%c0, %c0_0] : memref<4x128xf32, #tpu.memory_space<vmem>>, vector<4x128xf32>
    %c0_1 = arith.constant 0 : index
    %c0_2 = arith.constant 0 : index
    %1 = vector.load %arg3[%c0_1, %c0_2] : memref<32x128xf32, #tpu.memory_space<vmem>>, vector<32x128xf32>
    %c0_3 = arith.constant 0 : index
    %c0_4 = arith.constant 0 : index
    %2 = vector.load %arg4[%c0_3, %c0_4] : memref<1x128xf32, #tpu.memory_space<vmem>>, vector<1x128xf32>
    %c0_5 = arith.constant 0 : index
    %c0_6 = arith.constant 0 : index
    %3 = vector.load %arg0[%c0_5, %c0_6] : memref<64x4xf32, #tpu.memory_space<vmem>>, vector<64x4xf32>
    %cst = arith.constant dense<0.000000e+00> : vector<64x128xf32>
    %4 = tpu.matmul %3, %0, %cst {dimension_numbers = #tpu.dot_dimension_numbers<[1], [0], [0], [1], [0, 0, 1, 1], [], []>} : vector<64x4xf32>, vector<4x128xf32>, vector<64x128xf32> -> vector<64x128xf32>
    %5 = vector.broadcast %2 : vector<1x128xf32> to vector<64x128xf32>
    %6 = arith.addf %4, %5 : vector<64x128xf32>
    %c0_7 = arith.constant 0 : index
    %c0_8 = arith.constant 0 : index
    %7 = vector.load %arg18[%c0_7, %c0_8] : memref<64x128xf32, #tpu.memory_space<vmem>>, vector<64x128xf32>
    tpu.vector_store %arg18[%c0_7, %c0_8], %6 {strides = array<i32>} : memref<64x128xf32, #tpu.memory_space<vmem>>, vector<64x128xf32>,
    %cst_9 = arith.constant 0.000000e+00 : f32
    %8 = vector.broadcast %cst_9 : f32 to vector<8x32xf32>
    %cst_10 = arith.constant 0.000000e+00 : f32
    %9 = vector.broadcast %cst_10 : f32 to vector<8x32xf32>
    %c0_i32 = arith.constant 0 : i32
    %c8_i32 = arith.constant 8 : i32
    %10 = arith.muli %c0_i32, %c8_i32 : i32
    %11 = tpu.assume_multiple %10, 8 : i32
    %12 = arith.index_cast %11 : i32 to index
    %c0_11 = arith.constant 0 : index
    %13 = vector.load %arg18[%12, %c0_11] : memref<64x128xf32, #tpu.memory_space<vmem>>, vector<8x128xf32>
    %cst_12 = arith.constant dense<0.000000e+00> : vector<8x128xf32>
    %14 = tpu.matmul %8, %1, %cst_12 {dimension_numbers = #tpu.dot_dimension_numbers<[1], [0], [0], [1], [0, 0, 1, 1], [], []>} : vector<8x32xf32>, vector<32x128xf32>, vector<8x128xf32> -> vector<8x128xf32>
    %15 = arith.addf %13, %14 : vector<8x128xf32>
    %16 = arith.negf %15 : vector<8x128xf32>
    %17 = math.exp %16 : vector<8x128xf32>
    %cst_13 = arith.constant 1.000000e+00 : f32
    %18 = vector.broadcast %cst_13 : f32 to vector<8x128xf32>
    %19 = arith.addf %18, %17 : vector<8x128xf32>
    %20 = arith.divf %18, %19 : vector<8x128xf32>
    %21 = math.tanh %15 : vector<8x128xf32>
    %22 = vector.extract_strided_slice %20 {offsets = [0, 0], sizes = [8, 32], strides = [1, 1]} : vector<8x128xf32> to vector<8x32xf32>
    %23 = vector.extract_strided_slice %20 {offsets = [0, 32], sizes = [8, 32], strides = [1, 1]} : vector<8x128xf32> to vector<8x32xf32>
    %24 = vector.extract_strided_slice %20 {offsets = [0, 96], sizes = [8, 32], strides = [1, 1]} : vector<8x128xf32> to vector<8x32xf32>
    %25 = vector.extract_strided_slice %21 {offsets = [0, 64], sizes = [8, 32], strides = [1, 1]} : vector<8x128xf32> to vector<8x32xf32>
    %26 = arith.mulf %23, %9 : vector<8x32xf32>
    %27 = arith.mulf %22, %25 : vector<8x32xf32>
    %28 = arith.addf %26, %27 : vector<8x32xf32>
    %29 = math.tanh %28 : vector<8x32xf32>
    %30 = arith.mulf %24, %29 : vector<8x32xf32>
    %31 = arith.index_cast %11 : i32 to index
    %c0_14 = arith.constant 0 : index
    %32 = vector.load %arg19[%31, %c0_14] : memref<64x32xf32, #tpu.memory_space<vmem>>, vector<8x32xf32>
    tpu.vector_store %arg19[%31, %c0_14], %30 {strides = array<i32>} : memref<64x32xf32, #tpu.memory_space<vmem>>, vector<8x32xf32>,
    %c1_i32 = arith.constant 1 : i32
    %c8_i32_15 = arith.constant 8 : i32
    %33 = arith.muli %c1_i32, %c8_i32_15 : i32
    %34 = tpu.assume_multiple %33, 8 : i32
    %35 = arith.index_cast %34 : i32 to index
    %c0_16 = arith.constant 0 : index
    %36 = vector.load %arg18[%35, %c0_16] : memref<64x128xf32, #tpu.memory_space<vmem>>, vector<8x128xf32>
    %cst_17 = arith.constant dense<0.000000e+00> : vector<8x128xf32>
    %37 = tpu.matmul %30, %1, %cst_17 {dimension_numbers = #tpu.dot_dimension_numbers<[1], [0], [0], [1], [0, 0, 1, 1], [], []>} : vector<8x32xf32>, vector<32x128xf32>, vector<8x128xf32> -> vector<8x128xf32>
    %38 = arith.addf %36, %37 : vector<8x128xf32>
    %39 = arith.negf %38 : vector<8x128xf32>
    %40 = math.exp %39 : vector<8x128xf32>
    %cst_18 = arith.constant 1.000000e+00 : f32
    %41 = vector.broadcast %cst_18 : f32 to vector<8x128xf32>
    %42 = arith.addf %41, %40 : vector<8x128xf32>
    %43 = arith.divf %41, %42 : vector<8x128xf32>
    %44 = math.tanh %38 : vector<8x128xf32>
    %45 = vector.extract_strided_slice %43 {offsets = [0, 0], sizes = [8, 32], strides = [1, 1]} : vector<8x128xf32> to vector<8x32xf32>
    %46 = vector.extract_strided_slice %43 {offsets = [0, 32], sizes = [8, 32], strides = [1, 1]} : vector<8x128xf32> to vector<8x32xf32>
    %47 = vector.extract_strided_slice %43 {offsets = [0, 96], sizes = [8, 32], strides = [1, 1]} : vector<8x128xf32> to vector<8x32xf32>
    %48 = vector.extract_strided_slice %44 {offsets = [0, 64], sizes = [8, 32], strides = [1, 1]} : vector<8x128xf32> to vector<8x32xf32>
    %49 = arith.mulf %46, %28 : vector<8x32xf32>
    %50 = arith.mulf %45, %48 : vector<8x32xf32>
    %51 = arith.addf %49, %50 : vector<8x32xf32>
    %52 = math.tanh %51 : vector<8x32xf32>
    %53 = arith.mulf %47, %52 : vector<8x32xf32>
    %54 = arith.index_cast %34 : i32 to index
    %c0_19 = arith.constant 0 : index
    %55 = vector.load %arg19[%54, %c0_19] : memref<64x32xf32, #tpu.memory_space<vmem>>, vector<8x32xf32>
    tpu.vector_store %arg19[%54, %c0_19], %53 {strides = array<i32>} : memref<64x32xf32, #tpu.memory_space<vmem>>, vector<8x32xf32>,
    %c2_i32 = arith.constant 2 : i32
    %c8_i32_20 = arith.constant 8 : i32
    %56 = arith.muli %c2_i32, %c8_i32_20 : i32
    %57 = tpu.assume_multiple %56, 8 : i32
    %58 = arith.index_cast %57 : i32 to index
    %c0_21 = arith.constant 0 : index
    %59 = vector.load %arg18[%58, %c0_21] : memref<64x128xf32, #tpu.memory_space<vmem>>, vector<8x128xf32>
    %cst_22 = arith.constant dense<0.000000e+00> : vector<8x128xf32>
    %60 = tpu.matmul %53, %1, %cst_22 {dimension_numbers = #tpu.dot_dimension_numbers<[1], [0], [0], [1], [0, 0, 1, 1], [], []>} : vector<8x32xf32>, vector<32x128xf32>, vector<8x128xf32> -> vector<8x128xf32>
    %61 = arith.addf %59, %60 : vector<8x128xf32>
    %62 = arith.negf %61 : vector<8x128xf32>
    %63 = math.exp %62 : vector<8x128xf32>
    %cst_23 = arith.constant 1.000000e+00 : f32
    %64 = vector.broadcast %cst_23 : f32 to vector<8x128xf32>
    %65 = arith.addf %64, %63 : vector<8x128xf32>
    %66 = arith.divf %64, %65 : vector<8x128xf32>
    %67 = math.tanh %61 : vector<8x128xf32>
    %68 = vector.extract_strided_slice %66 {offsets = [0, 0], sizes = [8, 32], strides = [1, 1]} : vector<8x128xf32> to vector<8x32xf32>
    %69 = vector.extract_strided_slice %66 {offsets = [0, 32], sizes = [8, 32], strides = [1, 1]} : vector<8x128xf32> to vector<8x32xf32>
    %70 = vector.extract_strided_slice %66 {offsets = [0, 96], sizes = [8, 32], strides = [1, 1]} : vector<8x128xf32> to vector<8x32xf32>
    %71 = vector.extract_strided_slice %67 {offsets = [0, 64], sizes = [8, 32], strides = [1, 1]} : vector<8x128xf32> to vector<8x32xf32>
    %72 = arith.mulf %69, %51 : vector<8x32xf32>
    %73 = arith.mulf %68, %71 : vector<8x32xf32>
    %74 = arith.addf %72, %73 : vector<8x32xf32>
    %75 = math.tanh %74 : vector<8x32xf32>
    %76 = arith.mulf %70, %75 : vector<8x32xf32>
    %77 = arith.index_cast %57 : i32 to index
    %c0_24 = arith.constant 0 : index
    %78 = vector.load %arg19[%77, %c0_24] : memref<64x32xf32, #tpu.memory_space<vmem>>, vector<8x32xf32>
    tpu.vector_store %arg19[%77, %c0_24], %76 {strides = array<i32>} : memref<64x32xf32, #tpu.memory_space<vmem>>, vector<8x32xf32>,
    %c3_i32 = arith.constant 3 : i32
    %c8_i32_25 = arith.constant 8 : i32
    %79 = arith.muli %c3_i32, %c8_i32_25 : i32
    %80 = tpu.assume_multiple %79, 8 : i32
    %81 = arith.index_cast %80 : i32 to index
    %c0_26 = arith.constant 0 : index
    %82 = vector.load %arg18[%81, %c0_26] : memref<64x128xf32, #tpu.memory_space<vmem>>, vector<8x128xf32>
    %cst_27 = arith.constant dense<0.000000e+00> : vector<8x128xf32>
    %83 = tpu.matmul %76, %1, %cst_27 {dimension_numbers = #tpu.dot_dimension_numbers<[1], [0], [0], [1], [0, 0, 1, 1], [], []>} : vector<8x32xf32>, vector<32x128xf32>, vector<8x128xf32> -> vector<8x128xf32>
    %84 = arith.addf %82, %83 : vector<8x128xf32>
    %85 = arith.negf %84 : vector<8x128xf32>
    %86 = math.exp %85 : vector<8x128xf32>
    %cst_28 = arith.constant 1.000000e+00 : f32
    %87 = vector.broadcast %cst_28 : f32 to vector<8x128xf32>
    %88 = arith.addf %87, %86 : vector<8x128xf32>
    %89 = arith.divf %87, %88 : vector<8x128xf32>
    %90 = math.tanh %84 : vector<8x128xf32>
    %91 = vector.extract_strided_slice %89 {offsets = [0, 0], sizes = [8, 32], strides = [1, 1]} : vector<8x128xf32> to vector<8x32xf32>
    %92 = vector.extract_strided_slice %89 {offsets = [0, 32], sizes = [8, 32], strides = [1, 1]} : vector<8x128xf32> to vector<8x32xf32>
    %93 = vector.extract_strided_slice %89 {offsets = [0, 96], sizes = [8, 32], strides = [1, 1]} : vector<8x128xf32> to vector<8x32xf32>
    %94 = vector.extract_strided_slice %90 {offsets = [0, 64], sizes = [8, 32], strides = [1, 1]} : vector<8x128xf32> to vector<8x32xf32>
    %95 = arith.mulf %92, %74 : vector<8x32xf32>
    %96 = arith.mulf %91, %94 : vector<8x32xf32>
    %97 = arith.addf %95, %96 : vector<8x32xf32>
    %98 = math.tanh %97 : vector<8x32xf32>
    %99 = arith.mulf %93, %98 : vector<8x32xf32>
    %100 = arith.index_cast %80 : i32 to index
    %c0_29 = arith.constant 0 : index
    %101 = vector.load %arg19[%100, %c0_29] : memref<64x32xf32, #tpu.memory_space<vmem>>, vector<8x32xf32>
    tpu.vector_store %arg19[%100, %c0_29], %99 {strides = array<i32>} : memref<64x32xf32, #tpu.memory_space<vmem>>, vector<8x32xf32>,
    %c4_i32 = arith.constant 4 : i32
    %c8_i32_30 = arith.constant 8 : i32
    %102 = arith.muli %c4_i32, %c8_i32_30 : i32
    %103 = tpu.assume_multiple %102, 8 : i32
    %104 = arith.index_cast %103 : i32 to index
    %c0_31 = arith.constant 0 : index
    %105 = vector.load %arg18[%104, %c0_31] : memref<64x128xf32, #tpu.memory_space<vmem>>, vector<8x128xf32>
    %cst_32 = arith.constant dense<0.000000e+00> : vector<8x128xf32>
    %106 = tpu.matmul %99, %1, %cst_32 {dimension_numbers = #tpu.dot_dimension_numbers<[1], [0], [0], [1], [0, 0, 1, 1], [], []>} : vector<8x32xf32>, vector<32x128xf32>, vector<8x128xf32> -> vector<8x128xf32>
    %107 = arith.addf %105, %106 : vector<8x128xf32>
    %108 = arith.negf %107 : vector<8x128xf32>
    %109 = math.exp %108 : vector<8x128xf32>
    %cst_33 = arith.constant 1.000000e+00 : f32
    %110 = vector.broadcast %cst_33 : f32 to vector<8x128xf32>
    %111 = arith.addf %110, %109 : vector<8x128xf32>
    %112 = arith.divf %110, %111 : vector<8x128xf32>
    %113 = math.tanh %107 : vector<8x128xf32>
    %114 = vector.extract_strided_slice %112 {offsets = [0, 0], sizes = [8, 32], strides = [1, 1]} : vector<8x128xf32> to vector<8x32xf32>
    %115 = vector.extract_strided_slice %112 {offsets = [0, 32], sizes = [8, 32], strides = [1, 1]} : vector<8x128xf32> to vector<8x32xf32>
    %116 = vector.extract_strided_slice %112 {offsets = [0, 96], sizes = [8, 32], strides = [1, 1]} : vector<8x128xf32> to vector<8x32xf32>
    %117 = vector.extract_strided_slice %113 {offsets = [0, 64], sizes = [8, 32], strides = [1, 1]} : vector<8x128xf32> to vector<8x32xf32>
    %118 = arith.mulf %115, %97 : vector<8x32xf32>
    %119 = arith.mulf %114, %117 : vector<8x32xf32>
    %120 = arith.addf %118, %119 : vector<8x32xf32>
    %121 = math.tanh %120 : vector<8x32xf32>
    %122 = arith.mulf %116, %121 : vector<8x32xf32>
    %123 = arith.index_cast %103 : i32 to index
    %c0_34 = arith.constant 0 : index
    %124 = vector.load %arg19[%123, %c0_34] : memref<64x32xf32, #tpu.memory_space<vmem>>, vector<8x32xf32>
    tpu.vector_store %arg19[%123, %c0_34], %122 {strides = array<i32>} : memref<64x32xf32, #tpu.memory_space<vmem>>, vector<8x32xf32>,
    %c5_i32 = arith.constant 5 : i32
    %c8_i32_35 = arith.constant 8 : i32
    %125 = arith.muli %c5_i32, %c8_i32_35 : i32
    %126 = tpu.assume_multiple %125, 8 : i32
    %127 = arith.index_cast %126 : i32 to index
    %c0_36 = arith.constant 0 : index
    %128 = vector.load %arg18[%127, %c0_36] : memref<64x128xf32, #tpu.memory_space<vmem>>, vector<8x128xf32>
    %cst_37 = arith.constant dense<0.000000e+00> : vector<8x128xf32>
    %129 = tpu.matmul %122, %1, %cst_37 {dimension_numbers = #tpu.dot_dimension_numbers<[1], [0], [0], [1], [0, 0, 1, 1], [], []>} : vector<8x32xf32>, vector<32x128xf32>, vector<8x128xf32> -> vector<8x128xf32>
    %130 = arith.addf %128, %129 : vector<8x128xf32>
    %131 = arith.negf %130 : vector<8x128xf32>
    %132 = math.exp %131 : vector<8x128xf32>
    %cst_38 = arith.constant 1.000000e+00 : f32
    %133 = vector.broadcast %cst_38 : f32 to vector<8x128xf32>
    %134 = arith.addf %133, %132 : vector<8x128xf32>
    %135 = arith.divf %133, %134 : vector<8x128xf32>
    %136 = math.tanh %130 : vector<8x128xf32>
    %137 = vector.extract_strided_slice %135 {offsets = [0, 0], sizes = [8, 32], strides = [1, 1]} : vector<8x128xf32> to vector<8x32xf32>
    %138 = vector.extract_strided_slice %135 {offsets = [0, 32], sizes = [8, 32], strides = [1, 1]} : vector<8x128xf32> to vector<8x32xf32>
    %139 = vector.extract_strided_slice %135 {offsets = [0, 96], sizes = [8, 32], strides = [1, 1]} : vector<8x128xf32> to vector<8x32xf32>
    %140 = vector.extract_strided_slice %136 {offsets = [0, 64], sizes = [8, 32], strides = [1, 1]} : vector<8x128xf32> to vector<8x32xf32>
    %141 = arith.mulf %138, %120 : vector<8x32xf32>
    %142 = arith.mulf %137, %140 : vector<8x32xf32>
    %143 = arith.addf %141, %142 : vector<8x32xf32>
    %144 = math.tanh %143 : vector<8x32xf32>
    %145 = arith.mulf %139, %144 : vector<8x32xf32>
    %146 = arith.index_cast %126 : i32 to index
    %c0_39 = arith.constant 0 : index
    %147 = vector.load %arg19[%146, %c0_39] : memref<64x32xf32, #tpu.memory_space<vmem>>, vector<8x32xf32>
    tpu.vector_store %arg19[%146, %c0_39], %145 {strides = array<i32>} : memref<64x32xf32, #tpu.memory_space<vmem>>, vector<8x32xf32>,
    %c6_i32 = arith.constant 6 : i32
    %c8_i32_40 = arith.constant 8 : i32
    %148 = arith.muli %c6_i32, %c8_i32_40 : i32
    %149 = tpu.assume_multiple %148, 8 : i32
    %150 = arith.index_cast %149 : i32 to index
    %c0_41 = arith.constant 0 : index
    %151 = vector.load %arg18[%150, %c0_41] : memref<64x128xf32, #tpu.memory_space<vmem>>, vector<8x128xf32>
    %cst_42 = arith.constant dense<0.000000e+00> : vector<8x128xf32>
    %152 = tpu.matmul %145, %1, %cst_42 {dimension_numbers = #tpu.dot_dimension_numbers<[1], [0], [0], [1], [0, 0, 1, 1], [], []>} : vector<8x32xf32>, vector<32x128xf32>, vector<8x128xf32> -> vector<8x128xf32>
    %153 = arith.addf %151, %152 : vector<8x128xf32>
    %154 = arith.negf %153 : vector<8x128xf32>
    %155 = math.exp %154 : vector<8x128xf32>
    %cst_43 = arith.constant 1.000000e+00 : f32
    %156 = vector.broadcast %cst_43 : f32 to vector<8x128xf32>
    %157 = arith.addf %156, %155 : vector<8x128xf32>
    %158 = arith.divf %156, %157 : vector<8x128xf32>
    %159 = math.tanh %153 : vector<8x128xf32>
    %160 = vector.extract_strided_slice %158 {offsets = [0, 0], sizes = [8, 32], strides = [1, 1]} : vector<8x128xf32> to vector<8x32xf32>
    %161 = vector.extract_strided_slice %158 {offsets = [0, 32], sizes = [8, 32], strides = [1, 1]} : vector<8x128xf32> to vector<8x32xf32>
    %162 = vector.extract_strided_slice %158 {offsets = [0, 96], sizes = [8, 32], strides = [1, 1]} : vector<8x128xf32> to vector<8x32xf32>
    %163 = vector.extract_strided_slice %159 {offsets = [0, 64], sizes = [8, 32], strides = [1, 1]} : vector<8x128xf32> to vector<8x32xf32>
    %164 = arith.mulf %161, %143 : vector<8x32xf32>
    %165 = arith.mulf %160, %163 : vector<8x32xf32>
    %166 = arith.addf %164, %165 : vector<8x32xf32>
    %167 = math.tanh %166 : vector<8x32xf32>
    %168 = arith.mulf %162, %167 : vector<8x32xf32>
    %169 = arith.index_cast %149 : i32 to index
    %c0_44 = arith.constant 0 : index
    %170 = vector.load %arg19[%169, %c0_44] : memref<64x32xf32, #tpu.memory_space<vmem>>, vector<8x32xf32>
    tpu.vector_store %arg19[%169, %c0_44], %168 {strides = array<i32>} : memref<64x32xf32, #tpu.memory_space<vmem>>, vector<8x32xf32>,
    %c7_i32 = arith.constant 7 : i32
    %c8_i32_45 = arith.constant 8 : i32
    %171 = arith.muli %c7_i32, %c8_i32_45 : i32
    %172 = tpu.assume_multiple %171, 8 : i32
    %173 = arith.index_cast %172 : i32 to index
    %c0_46 = arith.constant 0 : index
    %174 = vector.load %arg18[%173, %c0_46] : memref<64x128xf32, #tpu.memory_space<vmem>>, vector<8x128xf32>
    %cst_47 = arith.constant dense<0.000000e+00> : vector<8x128xf32>
    %175 = tpu.matmul %168, %1, %cst_47 {dimension_numbers = #tpu.dot_dimension_numbers<[1], [0], [0], [1], [0, 0, 1, 1], [], []>} : vector<8x32xf32>, vector<32x128xf32>, vector<8x128xf32> -> vector<8x128xf32>
    %176 = arith.addf %174, %175 : vector<8x128xf32>
    %177 = arith.negf %176 : vector<8x128xf32>
    %178 = math.exp %177 : vector<8x128xf32>
    %cst_48 = arith.constant 1.000000e+00 : f32
    %179 = vector.broadcast %cst_48 : f32 to vector<8x128xf32>
    %180 = arith.addf %179, %178 : vector<8x128xf32>
    %181 = arith.divf %179, %180 : vector<8x128xf32>
    %182 = math.tanh %176 : vector<8x128xf32>
    %183 = vector.extract_strided_slice %181 {offsets = [0, 0], sizes = [8, 32], strides = [1, 1]} : vector<8x128xf32> to vector<8x32xf32>
    %184 = vector.extract_strided_slice %181 {offsets = [0, 32], sizes = [8, 32], strides = [1, 1]} : vector<8x128xf32> to vector<8x32xf32>
    %185 = vector.extract_strided_slice %181 {offsets = [0, 96], sizes = [8, 32], strides = [1, 1]} : vector<8x128xf32> to vector<8x32xf32>
    %186 = vector.extract_strided_slice %182 {offsets = [0, 64], sizes = [8, 32], strides = [1, 1]} : vector<8x128xf32> to vector<8x32xf32>
    %187 = arith.mulf %184, %166 : vector<8x32xf32>
    %188 = arith.mulf %183, %186 : vector<8x32xf32>
    %189 = arith.addf %187, %188 : vector<8x32xf32>
    %190 = math.tanh %189 : vector<8x32xf32>
    %191 = arith.mulf %185, %190 : vector<8x32xf32>
    %192 = arith.index_cast %172 : i32 to index
    %c0_49 = arith.constant 0 : index
    %193 = vector.load %arg19[%192, %c0_49] : memref<64x32xf32, #tpu.memory_space<vmem>>, vector<8x32xf32>
    tpu.vector_store %arg19[%192, %c0_49], %191 {strides = array<i32>} : memref<64x32xf32, #tpu.memory_space<vmem>>, vector<8x32xf32>,
    %c8_i32_50 = arith.constant 8 : i32
    %c0_51 = arith.constant 0 : index
    %c0_52 = arith.constant 0 : index
    %194 = vector.load %arg5[%c0_51, %c0_52] : memref<32x128xf32, #tpu.memory_space<vmem>>, vector<32x128xf32>
    %c0_53 = arith.constant 0 : index
    %c0_54 = arith.constant 0 : index
    %195 = vector.load %arg6[%c0_53, %c0_54] : memref<32x128xf32, #tpu.memory_space<vmem>>, vector<32x128xf32>
    %c0_55 = arith.constant 0 : index
    %c0_56 = arith.constant 0 : index
    %196 = vector.load %arg7[%c0_55, %c0_56] : memref<1x128xf32, #tpu.memory_space<vmem>>, vector<1x128xf32>
    %c0_57 = arith.constant 0 : index
    %c0_58 = arith.constant 0 : index
    %197 = vector.load %arg19[%c0_57, %c0_58] : memref<64x32xf32, #tpu.memory_space<vmem>>, vector<64x32xf32>
    %cst_59 = arith.constant dense<0.000000e+00> : vector<64x128xf32>
    %198 = tpu.matmul %197, %194, %cst_59 {dimension_numbers = #tpu.dot_dimension_numbers<[1], [0], [0], [1], [0, 0, 1, 1], [], []>} : vector<64x32xf32>, vector<32x128xf32>, vector<64x128xf32> -> vector<64x128xf32>
    %199 = vector.broadcast %196 : vector<1x128xf32> to vector<64x128xf32>
    %200 = arith.addf %198, %199 : vector<64x128xf32>
    %c0_60 = arith.constant 0 : index
    %c0_61 = arith.constant 0 : index
    %201 = vector.load %arg18[%c0_60, %c0_61] : memref<64x128xf32, #tpu.memory_space<vmem>>, vector<64x128xf32>
    tpu.vector_store %arg18[%c0_60, %c0_61], %200 {strides = array<i32>} : memref<64x128xf32, #tpu.memory_space<vmem>>, vector<64x128xf32>,
    %cst_62 = arith.constant 0.000000e+00 : f32
    %202 = vector.broadcast %cst_62 : f32 to vector<8x32xf32>
    %cst_63 = arith.constant 0.000000e+00 : f32
    %203 = vector.broadcast %cst_63 : f32 to vector<8x32xf32>
    %c0_i32_64 = arith.constant 0 : i32
    %c8_i32_65 = arith.constant 8 : i32
    %204 = arith.muli %c0_i32_64, %c8_i32_65 : i32
    %205 = tpu.assume_multiple %204, 8 : i32
    %206 = arith.index_cast %205 : i32 to index
    %c0_66 = arith.constant 0 : index
    %207 = vector.load %arg18[%206, %c0_66] : memref<64x128xf32, #tpu.memory_space<vmem>>, vector<8x128xf32>
    %cst_67 = arith.constant dense<0.000000e+00> : vector<8x128xf32>
    %208 = tpu.matmul %202, %195, %cst_67 {dimension_numbers = #tpu.dot_dimension_numbers<[1], [0], [0], [1], [0, 0, 1, 1], [], []>} : vector<8x32xf32>, vector<32x128xf32>, vector<8x128xf32> -> vector<8x128xf32>
    %209 = arith.addf %207, %208 : vector<8x128xf32>
    %210 = arith.negf %209 : vector<8x128xf32>
    %211 = math.exp %210 : vector<8x128xf32>
    %cst_68 = arith.constant 1.000000e+00 : f32
    %212 = vector.broadcast %cst_68 : f32 to vector<8x128xf32>
    %213 = arith.addf %212, %211 : vector<8x128xf32>
    %214 = arith.divf %212, %213 : vector<8x128xf32>
    %215 = math.tanh %209 : vector<8x128xf32>
    %216 = vector.extract_strided_slice %214 {offsets = [0, 0], sizes = [8, 32], strides = [1, 1]} : vector<8x128xf32> to vector<8x32xf32>
    %217 = vector.extract_strided_slice %214 {offsets = [0, 32], sizes = [8, 32], strides = [1, 1]} : vector<8x128xf32> to vector<8x32xf32>
    %218 = vector.extract_strided_slice %214 {offsets = [0, 96], sizes = [8, 32], strides = [1, 1]} : vector<8x128xf32> to vector<8x32xf32>
    %219 = vector.extract_strided_slice %215 {offsets = [0, 64], sizes = [8, 32], strides = [1, 1]} : vector<8x128xf32> to vector<8x32xf32>
    %220 = arith.mulf %217, %203 : vector<8x32xf32>
    %221 = arith.mulf %216, %219 : vector<8x32xf32>
    %222 = arith.addf %220, %221 : vector<8x32xf32>
    %223 = math.tanh %222 : vector<8x32xf32>
    %224 = arith.mulf %218, %223 : vector<8x32xf32>
    %c1_i32_69 = arith.constant 1 : i32
    %c8_i32_70 = arith.constant 8 : i32
    %225 = arith.muli %c1_i32_69, %c8_i32_70 : i32
    %226 = tpu.assume_multiple %225, 8 : i32
    %227 = arith.index_cast %226 : i32 to index
    %c0_71 = arith.constant 0 : index
    %228 = vector.load %arg18[%227, %c0_71] : memref<64x128xf32, #tpu.memory_space<vmem>>, vector<8x128xf32>
    %cst_72 = arith.constant dense<0.000000e+00> : vector<8x128xf32>
    %229 = tpu.matmul %224, %195, %cst_72 {dimension_numbers = #tpu.dot_dimension_numbers<[1], [0], [0], [1], [0, 0, 1, 1], [], []>} : vector<8x32xf32>, vector<32x128xf32>, vector<8x128xf32> -> vector<8x128xf32>
    %230 = arith.addf %228, %229 : vector<8x128xf32>
    %231 = arith.negf %230 : vector<8x128xf32>
    %232 = math.exp %231 : vector<8x128xf32>
    %cst_73 = arith.constant 1.000000e+00 : f32
    %233 = vector.broadcast %cst_73 : f32 to vector<8x128xf32>
    %234 = arith.addf %233, %232 : vector<8x128xf32>
    %235 = arith.divf %233, %234 : vector<8x128xf32>
    %236 = math.tanh %230 : vector<8x128xf32>
    %237 = vector.extract_strided_slice %235 {offsets = [0, 0], sizes = [8, 32], strides = [1, 1]} : vector<8x128xf32> to vector<8x32xf32>
    %238 = vector.extract_strided_slice %235 {offsets = [0, 32], sizes = [8, 32], strides = [1, 1]} : vector<8x128xf32> to vector<8x32xf32>
    %239 = vector.extract_strided_slice %235 {offsets = [0, 96], sizes = [8, 32], strides = [1, 1]} : vector<8x128xf32> to vector<8x32xf32>
    %240 = vector.extract_strided_slice %236 {offsets = [0, 64], sizes = [8, 32], strides = [1, 1]} : vector<8x128xf32> to vector<8x32xf32>
    %241 = arith.mulf %238, %222 : vector<8x32xf32>
    %242 = arith.mulf %237, %240 : vector<8x32xf32>
    %243 = arith.addf %241, %242 : vector<8x32xf32>
    %244 = math.tanh %243 : vector<8x32xf32>
    %245 = arith.mulf %239, %244 : vector<8x32xf32>
    %c2_i32_74 = arith.constant 2 : i32
    %c8_i32_75 = arith.constant 8 : i32
    %246 = arith.muli %c2_i32_74, %c8_i32_75 : i32
    %247 = tpu.assume_multiple %246, 8 : i32
    %248 = arith.index_cast %247 : i32 to index
    %c0_76 = arith.constant 0 : index
    %249 = vector.load %arg18[%248, %c0_76] : memref<64x128xf32, #tpu.memory_space<vmem>>, vector<8x128xf32>
    %cst_77 = arith.constant dense<0.000000e+00> : vector<8x128xf32>
    %250 = tpu.matmul %245, %195, %cst_77 {dimension_numbers = #tpu.dot_dimension_numbers<[1], [0], [0], [1], [0, 0, 1, 1], [], []>} : vector<8x32xf32>, vector<32x128xf32>, vector<8x128xf32> -> vector<8x128xf32>
    %251 = arith.addf %249, %250 : vector<8x128xf32>
    %252 = arith.negf %251 : vector<8x128xf32>
    %253 = math.exp %252 : vector<8x128xf32>
    %cst_78 = arith.constant 1.000000e+00 : f32
    %254 = vector.broadcast %cst_78 : f32 to vector<8x128xf32>
    %255 = arith.addf %254, %253 : vector<8x128xf32>
    %256 = arith.divf %254, %255 : vector<8x128xf32>
    %257 = math.tanh %251 : vector<8x128xf32>
    %258 = vector.extract_strided_slice %256 {offsets = [0, 0], sizes = [8, 32], strides = [1, 1]} : vector<8x128xf32> to vector<8x32xf32>
    %259 = vector.extract_strided_slice %256 {offsets = [0, 32], sizes = [8, 32], strides = [1, 1]} : vector<8x128xf32> to vector<8x32xf32>
    %260 = vector.extract_strided_slice %256 {offsets = [0, 96], sizes = [8, 32], strides = [1, 1]} : vector<8x128xf32> to vector<8x32xf32>
    %261 = vector.extract_strided_slice %257 {offsets = [0, 64], sizes = [8, 32], strides = [1, 1]} : vector<8x128xf32> to vector<8x32xf32>
    %262 = arith.mulf %259, %243 : vector<8x32xf32>
    %263 = arith.mulf %258, %261 : vector<8x32xf32>
    %264 = arith.addf %262, %263 : vector<8x32xf32>
    %265 = math.tanh %264 : vector<8x32xf32>
    %266 = arith.mulf %260, %265 : vector<8x32xf32>
    %c3_i32_79 = arith.constant 3 : i32
    %c8_i32_80 = arith.constant 8 : i32
    %267 = arith.muli %c3_i32_79, %c8_i32_80 : i32
    %268 = tpu.assume_multiple %267, 8 : i32
    %269 = arith.index_cast %268 : i32 to index
    %c0_81 = arith.constant 0 : index
    %270 = vector.load %arg18[%269, %c0_81] : memref<64x128xf32, #tpu.memory_space<vmem>>, vector<8x128xf32>
    %cst_82 = arith.constant dense<0.000000e+00> : vector<8x128xf32>
    %271 = tpu.matmul %266, %195, %cst_82 {dimension_numbers = #tpu.dot_dimension_numbers<[1], [0], [0], [1], [0, 0, 1, 1], [], []>} : vector<8x32xf32>, vector<32x128xf32>, vector<8x128xf32> -> vector<8x128xf32>
    %272 = arith.addf %270, %271 : vector<8x128xf32>
    %273 = arith.negf %272 : vector<8x128xf32>
    %274 = math.exp %273 : vector<8x128xf32>
    %cst_83 = arith.constant 1.000000e+00 : f32
    %275 = vector.broadcast %cst_83 : f32 to vector<8x128xf32>
    %276 = arith.addf %275, %274 : vector<8x128xf32>
    %277 = arith.divf %275, %276 : vector<8x128xf32>
    %278 = math.tanh %272 : vector<8x128xf32>
    %279 = vector.extract_strided_slice %277 {offsets = [0, 0], sizes = [8, 32], strides = [1, 1]} : vector<8x128xf32> to vector<8x32xf32>
    %280 = vector.extract_strided_slice %277 {offsets = [0, 32], sizes = [8, 32], strides = [1, 1]} : vector<8x128xf32> to vector<8x32xf32>
    %281 = vector.extract_strided_slice %277 {offsets = [0, 96], sizes = [8, 32], strides = [1, 1]} : vector<8x128xf32> to vector<8x32xf32>
    %282 = vector.extract_strided_slice %278 {offsets = [0, 64], sizes = [8, 32], strides = [1, 1]} : vector<8x128xf32> to vector<8x32xf32>
    %283 = arith.mulf %280, %264 : vector<8x32xf32>
    %284 = arith.mulf %279, %282 : vector<8x32xf32>
    %285 = arith.addf %283, %284 : vector<8x32xf32>
    %286 = math.tanh %285 : vector<8x32xf32>
    %287 = arith.mulf %281, %286 : vector<8x32xf32>
    %c4_i32_84 = arith.constant 4 : i32
    %c8_i32_85 = arith.constant 8 : i32
    %288 = arith.muli %c4_i32_84, %c8_i32_85 : i32
    %289 = tpu.assume_multiple %288, 8 : i32
    %290 = arith.index_cast %289 : i32 to index
    %c0_86 = arith.constant 0 : index
    %291 = vector.load %arg18[%290, %c0_86] : memref<64x128xf32, #tpu.memory_space<vmem>>, vector<8x128xf32>
    %cst_87 = arith.constant dense<0.000000e+00> : vector<8x128xf32>
    %292 = tpu.matmul %287, %195, %cst_87 {dimension_numbers = #tpu.dot_dimension_numbers<[1], [0], [0], [1], [0, 0, 1, 1], [], []>} : vector<8x32xf32>, vector<32x128xf32>, vector<8x128xf32> -> vector<8x128xf32>
    %293 = arith.addf %291, %292 : vector<8x128xf32>
    %294 = arith.negf %293 : vector<8x128xf32>
    %295 = math.exp %294 : vector<8x128xf32>
    %cst_88 = arith.constant 1.000000e+00 : f32
    %296 = vector.broadcast %cst_88 : f32 to vector<8x128xf32>
    %297 = arith.addf %296, %295 : vector<8x128xf32>
    %298 = arith.divf %296, %297 : vector<8x128xf32>
    %299 = math.tanh %293 : vector<8x128xf32>
    %300 = vector.extract_strided_slice %298 {offsets = [0, 0], sizes = [8, 32], strides = [1, 1]} : vector<8x128xf32> to vector<8x32xf32>
    %301 = vector.extract_strided_slice %298 {offsets = [0, 32], sizes = [8, 32], strides = [1, 1]} : vector<8x128xf32> to vector<8x32xf32>
    %302 = vector.extract_strided_slice %298 {offsets = [0, 96], sizes = [8, 32], strides = [1, 1]} : vector<8x128xf32> to vector<8x32xf32>
    %303 = vector.extract_strided_slice %299 {offsets = [0, 64], sizes = [8, 32], strides = [1, 1]} : vector<8x128xf32> to vector<8x32xf32>
    %304 = arith.mulf %301, %285 : vector<8x32xf32>
    %305 = arith.mulf %300, %303 : vector<8x32xf32>
    %306 = arith.addf %304, %305 : vector<8x32xf32>
    %307 = math.tanh %306 : vector<8x32xf32>
    %308 = arith.mulf %302, %307 : vector<8x32xf32>
    %c5_i32_89 = arith.constant 5 : i32
    %c8_i32_90 = arith.constant 8 : i32
    %309 = arith.muli %c5_i32_89, %c8_i32_90 : i32
    %310 = tpu.assume_multiple %309, 8 : i32
    %311 = arith.index_cast %310 : i32 to index
    %c0_91 = arith.constant 0 : index
    %312 = vector.load %arg18[%311, %c0_91] : memref<64x128xf32, #tpu.memory_space<vmem>>, vector<8x128xf32>
    %cst_92 = arith.constant dense<0.000000e+00> : vector<8x128xf32>
    %313 = tpu.matmul %308, %195, %cst_92 {dimension_numbers = #tpu.dot_dimension_numbers<[1], [0], [0], [1], [0, 0, 1, 1], [], []>} : vector<8x32xf32>, vector<32x128xf32>, vector<8x128xf32> -> vector<8x128xf32>
    %314 = arith.addf %312, %313 : vector<8x128xf32>
    %315 = arith.negf %314 : vector<8x128xf32>
    %316 = math.exp %315 : vector<8x128xf32>
    %cst_93 = arith.constant 1.000000e+00 : f32
    %317 = vector.broadcast %cst_93 : f32 to vector<8x128xf32>
    %318 = arith.addf %317, %316 : vector<8x128xf32>
    %319 = arith.divf %317, %318 : vector<8x128xf32>
    %320 = math.tanh %314 : vector<8x128xf32>
    %321 = vector.extract_strided_slice %319 {offsets = [0, 0], sizes = [8, 32], strides = [1, 1]} : vector<8x128xf32> to vector<8x32xf32>
    %322 = vector.extract_strided_slice %319 {offsets = [0, 32], sizes = [8, 32], strides = [1, 1]} : vector<8x128xf32> to vector<8x32xf32>
    %323 = vector.extract_strided_slice %319 {offsets = [0, 96], sizes = [8, 32], strides = [1, 1]} : vector<8x128xf32> to vector<8x32xf32>
    %324 = vector.extract_strided_slice %320 {offsets = [0, 64], sizes = [8, 32], strides = [1, 1]} : vector<8x128xf32> to vector<8x32xf32>
    %325 = arith.mulf %322, %306 : vector<8x32xf32>
    %326 = arith.mulf %321, %324 : vector<8x32xf32>
    %327 = arith.addf %325, %326 : vector<8x32xf32>
    %328 = math.tanh %327 : vector<8x32xf32>
    %329 = arith.mulf %323, %328 : vector<8x32xf32>
    %c6_i32_94 = arith.constant 6 : i32
    %c8_i32_95 = arith.constant 8 : i32
    %330 = arith.muli %c6_i32_94, %c8_i32_95 : i32
    %331 = tpu.assume_multiple %330, 8 : i32
    %332 = arith.index_cast %331 : i32 to index
    %c0_96 = arith.constant 0 : index
    %333 = vector.load %arg18[%332, %c0_96] : memref<64x128xf32, #tpu.memory_space<vmem>>, vector<8x128xf32>
    %cst_97 = arith.constant dense<0.000000e+00> : vector<8x128xf32>
    %334 = tpu.matmul %329, %195, %cst_97 {dimension_numbers = #tpu.dot_dimension_numbers<[1], [0], [0], [1], [0, 0, 1, 1], [], []>} : vector<8x32xf32>, vector<32x128xf32>, vector<8x128xf32> -> vector<8x128xf32>
    %335 = arith.addf %333, %334 : vector<8x128xf32>
    %336 = arith.negf %335 : vector<8x128xf32>
    %337 = math.exp %336 : vector<8x128xf32>
    %cst_98 = arith.constant 1.000000e+00 : f32
    %338 = vector.broadcast %cst_98 : f32 to vector<8x128xf32>
    %339 = arith.addf %338, %337 : vector<8x128xf32>
    %340 = arith.divf %338, %339 : vector<8x128xf32>
    %341 = math.tanh %335 : vector<8x128xf32>
    %342 = vector.extract_strided_slice %340 {offsets = [0, 0], sizes = [8, 32], strides = [1, 1]} : vector<8x128xf32> to vector<8x32xf32>
    %343 = vector.extract_strided_slice %340 {offsets = [0, 32], sizes = [8, 32], strides = [1, 1]} : vector<8x128xf32> to vector<8x32xf32>
    %344 = vector.extract_strided_slice %340 {offsets = [0, 96], sizes = [8, 32], strides = [1, 1]} : vector<8x128xf32> to vector<8x32xf32>
    %345 = vector.extract_strided_slice %341 {offsets = [0, 64], sizes = [8, 32], strides = [1, 1]} : vector<8x128xf32> to vector<8x32xf32>
    %346 = arith.mulf %343, %327 : vector<8x32xf32>
    %347 = arith.mulf %342, %345 : vector<8x32xf32>
    %348 = arith.addf %346, %347 : vector<8x32xf32>
    %349 = math.tanh %348 : vector<8x32xf32>
    %350 = arith.mulf %344, %349 : vector<8x32xf32>
    %c7_i32_99 = arith.constant 7 : i32
    %c8_i32_100 = arith.constant 8 : i32
    %351 = arith.muli %c7_i32_99, %c8_i32_100 : i32
    %352 = tpu.assume_multiple %351, 8 : i32
    %353 = arith.index_cast %352 : i32 to index
    %c0_101 = arith.constant 0 : index
    %354 = vector.load %arg18[%353, %c0_101] : memref<64x128xf32, #tpu.memory_space<vmem>>, vector<8x128xf32>
    %cst_102 = arith.constant dense<0.000000e+00> : vector<8x128xf32>
    %355 = tpu.matmul %350, %195, %cst_102 {dimension_numbers = #tpu.dot_dimension_numbers<[1], [0], [0], [1], [0, 0, 1, 1], [], []>} : vector<8x32xf32>, vector<32x128xf32>, vector<8x128xf32> -> vector<8x128xf32>
    %356 = arith.addf %354, %355 : vector<8x128xf32>
    %357 = arith.negf %356 : vector<8x128xf32>
    %358 = math.exp %357 : vector<8x128xf32>
    %cst_103 = arith.constant 1.000000e+00 : f32
    %359 = vector.broadcast %cst_103 : f32 to vector<8x128xf32>
    %360 = arith.addf %359, %358 : vector<8x128xf32>
    %361 = arith.divf %359, %360 : vector<8x128xf32>
    %362 = math.tanh %356 : vector<8x128xf32>
    %363 = vector.extract_strided_slice %361 {offsets = [0, 0], sizes = [8, 32], strides = [1, 1]} : vector<8x128xf32> to vector<8x32xf32>
    %364 = vector.extract_strided_slice %361 {offsets = [0, 32], sizes = [8, 32], strides = [1, 1]} : vector<8x128xf32> to vector<8x32xf32>
    %365 = vector.extract_strided_slice %361 {offsets = [0, 96], sizes = [8, 32], strides = [1, 1]} : vector<8x128xf32> to vector<8x32xf32>
    %366 = vector.extract_strided_slice %362 {offsets = [0, 64], sizes = [8, 32], strides = [1, 1]} : vector<8x128xf32> to vector<8x32xf32>
    %367 = arith.mulf %364, %348 : vector<8x32xf32>
    %368 = arith.mulf %363, %366 : vector<8x32xf32>
    %369 = arith.addf %367, %368 : vector<8x32xf32>
    %370 = math.tanh %369 : vector<8x32xf32>
    %371 = arith.mulf %365, %370 : vector<8x32xf32>
    %c8_i32_104 = arith.constant 8 : i32
    %c0_105 = arith.constant 0 : index
    %c0_106 = arith.constant 0 : index
    %372 = vector.load %arg1[%c0_105, %c0_106] : memref<8x8xf32, #tpu.memory_space<vmem>>, vector<8x8xf32>
    %c0_107 = arith.constant 0 : index
    %c0_108 = arith.constant 0 : index
    %373 = vector.load %arg8[%c0_107, %c0_108] : memref<8x32xf32, #tpu.memory_space<vmem>>, vector<8x32xf32>
    %cst_109 = arith.constant dense<0.000000e+00> : vector<8x32xf32>
    %374 = tpu.matmul %372, %373, %cst_109 {dimension_numbers = #tpu.dot_dimension_numbers<[1], [0], [0], [1], [0, 0, 1, 1], [], []>} : vector<8x8xf32>, vector<8x32xf32>, vector<8x32xf32> -> vector<8x32xf32>
    %c0_110 = arith.constant 0 : index
    %c0_111 = arith.constant 0 : index
    %375 = vector.load %arg9[%c0_110, %c0_111] : memref<1x32xf32, #tpu.memory_space<vmem>>, vector<1x32xf32>
    %376 = vector.broadcast %375 : vector<1x32xf32> to vector<8x32xf32>
    %377 = arith.addf %374, %376 : vector<8x32xf32>
    %cst_112 = arith.constant 0.000000e+00 : f32
    %378 = vector.broadcast %cst_112 : f32 to vector<8x32xf32>
    %379 = arith.maximumf %377, %378 : vector<8x32xf32>
    %c0_113 = arith.constant 0 : index
    %c0_114 = arith.constant 0 : index
    %380 = vector.load %arg10[%c0_113, %c0_114] : memref<32x32xf32, #tpu.memory_space<vmem>>, vector<32x32xf32>
    %cst_115 = arith.constant dense<0.000000e+00> : vector<8x32xf32>
    %381 = tpu.matmul %379, %380, %cst_115 {dimension_numbers = #tpu.dot_dimension_numbers<[1], [0], [0], [1], [0, 0, 1, 1], [], []>} : vector<8x32xf32>, vector<32x32xf32>, vector<8x32xf32> -> vector<8x32xf32>
    %c0_116 = arith.constant 0 : index
    %c0_117 = arith.constant 0 : index
    %382 = vector.load %arg11[%c0_116, %c0_117] : memref<1x32xf32, #tpu.memory_space<vmem>>, vector<1x32xf32>
    %383 = vector.broadcast %382 : vector<1x32xf32> to vector<8x32xf32>
    %384 = arith.addf %381, %383 : vector<8x32xf32>
    %cst_118 = arith.constant 0.000000e+00 : f32
    %385 = vector.broadcast %cst_118 : f32 to vector<8x32xf32>
    %386 = arith.maximumf %384, %385 : vector<8x32xf32>
    %c0_119 = arith.constant 0 : index
    %c0_120 = arith.constant 0 : index
    %387 = vector.load %arg12[%c0_119, %c0_120] : memref<32x32xf32, #tpu.memory_space<vmem>>, vector<32x32xf32>
    %cst_121 = arith.constant dense<0.000000e+00> : vector<8x32xf32>
    %388 = tpu.matmul %371, %387, %cst_121 {dimension_numbers = #tpu.dot_dimension_numbers<[1], [0], [0], [1], [0, 0, 1, 1], [], []>} : vector<8x32xf32>, vector<32x32xf32>, vector<8x32xf32> -> vector<8x32xf32>
    %c0_122 = arith.constant 0 : index
    %c0_123 = arith.constant 0 : index
    %389 = vector.load %arg13[%c0_122, %c0_123] : memref<32x32xf32, #tpu.memory_space<vmem>>, vector<32x32xf32>
    %cst_124 = arith.constant dense<0.000000e+00> : vector<8x32xf32>
    %390 = tpu.matmul %386, %389, %cst_124 {dimension_numbers = #tpu.dot_dimension_numbers<[1], [0], [0], [1], [0, 0, 1, 1], [], []>} : vector<8x32xf32>, vector<32x32xf32>, vector<8x32xf32> -> vector<8x32xf32>
    %391 = arith.addf %388, %390 : vector<8x32xf32>
    %c0_125 = arith.constant 0 : index
    %c0_126 = arith.constant 0 : index
    %392 = vector.load %arg14[%c0_125, %c0_126] : memref<1x32xf32, #tpu.memory_space<vmem>>, vector<1x32xf32>
    %393 = vector.broadcast %392 : vector<1x32xf32> to vector<8x32xf32>
    %394 = arith.addf %391, %393 : vector<8x32xf32>
    %cst_127 = arith.constant 0.000000e+00 : f32
    %395 = vector.broadcast %cst_127 : f32 to vector<8x32xf32>
    %396 = arith.maximumf %394, %395 : vector<8x32xf32>
    %c0_128 = arith.constant 0 : index
    %c0_129 = arith.constant 0 : index
    %397 = vector.load %arg15[%c0_128, %c0_129] : memref<32x128xf32, #tpu.memory_space<vmem>>, vector<32x128xf32>
    %cst_130 = arith.constant dense<0.000000e+00> : vector<8x128xf32>
    %398 = tpu.matmul %396, %397, %cst_130 {dimension_numbers = #tpu.dot_dimension_numbers<[1], [0], [0], [1], [0, 0, 1, 1], [], []>} : vector<8x32xf32>, vector<32x128xf32>, vector<8x128xf32> -> vector<8x128xf32>
    %c0_131 = arith.constant 0 : index
    %c0_132 = arith.constant 0 : index
    %399 = vector.load %arg16[%c0_131, %c0_132] : memref<1x128xf32, #tpu.memory_space<vmem>>, vector<1x128xf32>
    %400 = vector.broadcast %399 : vector<1x128xf32> to vector<8x128xf32>
    %401 = arith.addf %398, %400 : vector<8x128xf32>
    %402 = arith.negf %401 : vector<8x128xf32>
    %403 = math.exp %402 : vector<8x128xf32>
    %cst_133 = arith.constant 1.000000e+00 : f32
    %404 = vector.broadcast %cst_133 : f32 to vector<8x128xf32>
    %405 = arith.addf %404, %403 : vector<8x128xf32>
    %406 = arith.divf %404, %405 : vector<8x128xf32>
    %c0_134 = arith.constant 0 : index
    %c0_135 = arith.constant 0 : index
    %407 = vector.load %arg17[%c0_134, %c0_135] : memref<8x128xf32, #tpu.memory_space<vmem>>, vector<8x128xf32>
    tpu.vector_store %arg17[%c0_134, %c0_135], %406 {strides = array<i32>} : memref<8x128xf32, #tpu.memory_space<vmem>>, vector<8x128xf32>,
    return
  }
}

</mosaic_0001>

<bundles_post_ra>
// kernel: tpu_custom_call.1
= control target key start
LH: loop header
LB: loop body
LE: loop exit
PB: predicated region body
PF: predicated region fallthrough
CT: control target
= control target key end

     0   :  { %s3887_s0 = inlined_call_operand.vmem [shape: f32[64,4], index: 0, kind: input, shape index: {}]   ;;  %s3888_s1 = inlined_call_operand.hbm [shape: f32[8,8], index: 1, kind: input, shape index: {}]   ;;  %s3889_s2 = inlined_call_operand.hbm [shape: f32[4,128], index: 2, kind: input, shape index: {}]   ;;  %s3890_s3 = inlined_call_operand.vmem [shape: f32[32,128], index: 3, kind: input, shape index: {}]   ;;  %s3891_s4 = inlined_call_operand.vmem [shape: f32[1,128], index: 4, kind: input, shape index: {}]   ;;  %s3892_s5 = inlined_call_operand.vmem [shape: f32[32,128], index: 5, kind: input, shape index: {}]   ;;  %s3893_s6 = inlined_call_operand.hbm [shape: f32[32,128], index: 6, kind: input, shape index: {}]   ;;  %s3894_s7 = inlined_call_operand.vmem [shape: f32[1,128], index: 7, kind: input, shape index: {}]   ;;  %s3895_s8 = inlined_call_operand.vmem [shape: f32[8,32], index: 8, kind: input, shape index: {}]   ;;  %s3896_s9 = inlined_call_operand.vmem [shape: f32[1,32], index: 9, kind: input, shape index: {}]   ;;  %s3897_s10 = inlined_call_operand.hbm [shape: f32[32,32], index: 10, kind: input, shape index: {}]   ;;  %s3898_s11 = inlined_call_operand.vmem [shape: f32[1,32], index: 11, kind: input, shape index: {}]   ;;  %s3899_s12 = inlined_call_operand.hbm [shape: f32[32,32], index: 12, kind: input, shape index: {}]   ;;  %s3900_s13 = inlined_call_operand.hbm [shape: f32[32,32], index: 13, kind: input, shape index: {}]   ;;  %s3901_s14 = inlined_call_operand.vmem [shape: f32[1,32], index: 14, kind: input, shape index: {}]   ;;  %s3902_s15 = inlined_call_operand.hbm [shape: f32[32,128], index: 15, kind: input, shape index: {}]   ;;  %s3903_s16 = inlined_call_operand.vmem [shape: f32[1,128], index: 16, kind: input, shape index: {}]   ;;  %s3904_s17 = inlined_call_operand.hbm [shape: f32[8,128], index: 17, kind: output, shape index: {}]  }
   0x1   :  { %3906 = sst [smem:[#allocation22_spill]] %s3887_s0 }
   0x2   :  { %3907 = sst [smem:[#allocation23_spill]] %s3888_s1 }
   0x3   :  { %22 = vsyncpa [#allocation5], 0 }
   0x4   :  { %23 = vsyncpa [#allocation8], 0 }
   0x5   :  { %24 = vsyncpa [#allocation11], 0 }
   0x6   :  { %25 = vsyncpa [#allocation14], 0 }
   0x7   :  { %26 = vsyncpa [#allocation6], 0  ;;  %s3313_s24 = smov [#allocation7]  }
   0x8   :  { %s45_s25 = sshll.u32 %s3313_s24, 4  ;;  %s46_s25 = int_to_ptr.vmem [resolvable:$true] %s45_s25 }
   0x9   :  { %s3151_s26 = scalar_lea.vmem %s46_s25, 64  ;;  %p3156_p1 = scmp.lt.s32.totalorder %s46_s25, %s46_s25 }
   0xa   :  { %p3152_p0 = scmp.ne.s32.totalorder %s46_s25, %s3151_s26  ;;  %p3157_p2 = scmp.lt.s32.totalorder %s3151_s26, %s3151_s26 }
   0xc   :  { %p3158_p3 = por %p3157_p2, %p3156_p1 }
   0xe   :  { %p3159_p4 = pnand %p3158_p3, %p3152_p0 }
  0x10   :  { %3162 = shalt.err (!%p3159_p4)
}
  0x11   :  { %48 = dma.hbm_to_vmem [thread:$0]  %s3889_s2, 64, %s46_s25, [#allocation8]  }
  0x12   :  { %s3314_s29 = smov [#allocation10]   ;;  %s3315_s30 = smov [#allocation13]  }
  0x13   :  { %s78_s0 = sshll.u32 %s3314_s29, 4  ;;  %s104_s18 = sshll.u32 %s3315_s30, 4  ;;  %s79_s0 = int_to_ptr.vmem [resolvable:$true] %s78_s0  ;;  %s105_s18 = int_to_ptr.vmem [resolvable:$true] %s104_s18 }
  0x14   :  { %s3171_s19 = scalar_lea.vmem %s79_s0, 512  ;;  %p3176_p6 = scmp.lt.s32.totalorder %s79_s0, %s79_s0 }
  0x15   :  { %p3172_p5 = scmp.ne.s32.totalorder %s79_s0, %s3171_s19  ;;  %p3177_p7 = scmp.lt.s32.totalorder %s3171_s19, %s3171_s19 }
  0x17   :  { %p3178_p8 = por %p3177_p7, %p3176_p6 }
  0x19   :  { %p3179_p9 = pnand %p3178_p8, %p3172_p5 }
  0x1b   :  { %3182 = shalt.err (!%p3179_p9)
}
  0x1c   :  { %s3316_s1 = smov 128   ;;  %s3317_s20 = smov 8  }
  0x1d   :  { %84 = dma.hbm_to_vmem [thread:$0]  %s3897_s10, 512, %s79_s0, [#allocation11], %s3316_s1, %s3316_s1, %s3317_s20  }
  0x1e   :  { %s3191_s2 = scalar_lea.vmem %s105_s18, 512  ;;  %p3196_p11 = scmp.lt.s32.totalorder %s105_s18, %s105_s18 }
  0x1f   :  { %p3192_p10 = scmp.ne.s32.totalorder %s105_s18, %s3191_s2  ;;  %p3197_p12 = scmp.lt.s32.totalorder %s3191_s2, %s3191_s2 }
  0x21   :  { %p3198_p13 = por %p3197_p12, %p3196_p11 }
  0x23   :  { %p3199_p0 = pnand %p3198_p13, %p3192_p10 }
  0x25   :  { %3202 = shalt.err (!%p3199_p0)
}
  0x26   :  { %110 = dma.hbm_to_vmem [thread:$0]  %s3900_s13, 512, %s105_s18, [#allocation14], %s3316_s1, %s3316_s1, %s3317_s20  }
  0x27   :  { %s3318_s25 = smov [#allocation4]   ;;  %s3319_s27 = smov [#allocation9]  }
  0x28   :  { %s35_s26 = sshll.u32 %s3318_s25, 4  ;;  %s60_s10 = sshll.u32 %s3319_s27, 4  ;;  %s36_s26 = int_to_ptr.vmem [resolvable:$true] %s35_s26  ;;  %s61_s10 = int_to_ptr.vmem [resolvable:$true] %s60_s10 }
  0x29   :  { %s3211_s28 = scalar_lea.vmem %s36_s26, 128  ;;  %p3216_p2 = scmp.lt.s32.totalorder %s36_s26, %s36_s26 }
  0x2a   :  { %p3212_p1 = scmp.ne.s32.totalorder %s36_s26, %s3211_s28  ;;  %p3217_p3 = scmp.lt.s32.totalorder %s3211_s28, %s3211_s28 }
  0x2c   :  { %p3218_p4 = por %p3217_p3, %p3216_p2 }
  0x2e   :  { %p3219_p5 = pnand %p3218_p4, %p3212_p1 }
  0x30   :  { %3222 = shalt.err (!%p3219_p5)
}
  0x31   :  { %s3908_s30 = sld [smem:[#allocation23_spill]]  ;;  %s3231_s19 = scalar_lea.vmem %s61_s10, 512 }
  0x32   :  { %p3232_p6 = scmp.ne.s32.totalorder %s61_s10, %s3231_s19  ;;  %p3236_p7 = scmp.lt.s32.totalorder %s61_s10, %s61_s10 }
  0x33   :  { %p3237_p8 = scmp.lt.s32.totalorder %s3231_s19, %s3231_s19 }
  0x35   :  { %p3238_p9 = por %p3237_p8, %p3236_p7 }
  0x37   :  { %38 = dma.hbm_to_vmem [thread:$0]  %s3908_s30, 128, %s36_s26, [#allocation5]  }
  0x38   :  { %p3239_p10 = pnand %p3238_p9, %p3232_p6 }
  0x3a   :  { %3242 = shalt.err (!%p3239_p10)
}
  0x3b   :  { %66 = dma.hbm_to_vmem [thread:$0]  %s3893_s6, 512, %s61_s10, [#allocation8], %s3316_s1, %s3316_s1, %s3317_s20  }
  0x3c   :  { %s3320_s21 = smov [#allocation12]   ;;  %s3321_s2 = smov [#allocation15]  }
  0x3d   :  { %s92_s22 = sshll.u32 %s3320_s21, 4  ;;  %s118_s23 = sshll.u32 %s3321_s2, 4  ;;  %s93_s22 = int_to_ptr.vmem [resolvable:$true] %s92_s22  ;;  %s119_s23 = int_to_ptr.vmem [resolvable:$true] %s118_s23 }
  0x3e   :  { %s3251_s24 = scalar_lea.vmem %s93_s22, 512  ;;  %p3256_p12 = scmp.lt.s32.totalorder %s93_s22, %s93_s22 }
  0x3f   :  { %p3252_p11 = scmp.ne.s32.totalorder %s93_s22, %s3251_s24  ;;  %p3257_p13 = scmp.lt.s32.totalorder %s3251_s24, %s3251_s24 }
  0x41   :  { %p3258_p0 = por %p3257_p13, %p3256_p12 }
  0x43   :  { %p3259_p1 = pnand %p3258_p0, %p3252_p11 }
  0x45   :  { %3262 = shalt.err (!%p3259_p1)
}
  0x46   :  { %98 = dma.hbm_to_vmem [thread:$0]  %s3899_s12, 512, %s93_s22, [#allocation11], %s3316_s1, %s3316_s1, %s3317_s20  }
  0x47   :  { %s3271_s6 = scalar_lea.vmem %s119_s23, 512  ;;  %p3276_p3 = scmp.lt.s32.totalorder %s119_s23, %s119_s23 }
  0x48   :  { %p3272_p2 = scmp.ne.s32.totalorder %s119_s23, %s3271_s6  ;;  %p3277_p4 = scmp.lt.s32.totalorder %s3271_s6, %s3271_s6 }
  0x4a   :  { %p3278_p5 = por %p3277_p4, %p3276_p3 }
  0x4c   :  { %p3279_p6 = pnand %p3278_p5, %p3272_p2 }
  0x4e   :  { %3282 = shalt.err (!%p3279_p6)
}
  0x4f   :  { %124 = dma.hbm_to_vmem [thread:$0]  %s3902_s15, 512, %s119_s23, [#allocation14], %s3316_s1, %s3316_s1, %s3317_s20  }
  0x50   :  { %3303 = dma.done.wait [#allocation5], 128  }
  0x51   :  { %3304 = vsyncadd [#allocation5], 4294967168 }
  0x52   :  { %3305 = dma.done.wait [#allocation8], 576  }
  0x53   :  { %3306 = vsyncadd [#allocation8], 4294966720 }
  0x54   :  { %3307 = dma.done.wait [#allocation11], 1024  }
  0x55   :  { %3308 = vsyncadd [#allocation11], 4294966272 }
  0x56   :  { %3309 = dma.done.wait [#allocation14], 1024  }
  0x57   :  { %3310 = vsyncadd [#allocation14], 4294966272  ;;  %v3322_v0 = vmov 0.0   ;;  %vm3323_vm0 = vmmov 0   ;;  %vm193_vm1 = vcmask 1043456   ;;  %vm168_vm2 = vcmask 31744  }
  0x58   :  { %2752 = vmatprep.subr.mxu1 %v3322_v0  ;;  %2760 = vmatprep.mubr.msk.f32.mxu1 %vm3323_vm0, %v3322_v0  ;;  %v148_v1 = vld [vmem:[#allocation7] sm:$0xf]  ;;  %v3459_v2 = vld [vmem:[%s3890_s3 + $0x18] sm:$0xff]  ;;  %s3909_s28 = sld [smem:[#allocation22_spill]]  ;;  %v3471_v5 = vld [vmem:[%s3890_s3 + $0x10] sm:$0xff]  ;;  %s3324_s23 = smov 64  }
  0x59   :  { %2738 = vmatprep.subr.msk.mxu0 %vm193_vm1, %v148_v1  ;;  %2753 = vmatpush3.msra.mxu1 %v3459_v2  ;;  %v3479_v6 = vld [vmem:[%s3890_s3 + $0x8] sm:$0xff]  ;;  %v3487_v7 = vld [vmem:[%s3890_s3] sm:$0xff]  ;;  %vm311_vm3 = vcmask 261120   ;;  %vm2122_vm4 = vcmask 64512   ;;  %s3326_s27 = smov [#allocation16]  }
  0x5a   :  { %2739 = vmatpush3.msk.msra.mxu0 %vm193_vm1, %v148_v1  ;;  %2754 = vmatprep.subr.mxu1 %v3322_v0  ;;  %v3515_v9 = vld [vmem:[%s3891_s4] ss:$0 sm:$0xff]  ;;  %s3325_s4 = smov 32  }
  0x5b   :  { %2755 = vmatpush3.msra.mxu1 %v3471_v5  ;;  %2774 = vmatprep.subr.mxu0 %v3322_v0 }
  0x5c   :  { %2756 = vmatprep.subr.mxu1 %v3322_v0 }
  0x5d   :  { %2757 = vmatpush3.msra.mxu1 %v3479_v6 }
  0x5e   :  { %v154_v3 = vld [vmem:[%s3909_s28] sm:$0xff]  ;;  %v155_v4 = vld [vmem:[%s3909_s28 + $0x8] sm:$0xff]  ;;  %2758 = vmatprep.subr.mxu1 %v3322_v0  ;;  %v156_v43 = vld [vmem:[%s3909_s28 + $0x10] sm:$0xff] }
  0x5f   :  { %2740 = vmatprep.mubr.msk.f32.mxu0 %vm168_vm2, %v154_v3  ;;  %2759 = vmatpush3.msra.mxu1 %v3487_v7  ;;  %v157_v44 = vld [vmem:[%s3909_s28 + $0x18] sm:$0xff]  ;;  %v158_v45 = vld [vmem:[%s3909_s28 + $0x20] sm:$0xff]  ;;  %v159_v46 = vld [vmem:[%s3909_s28 + $0x28] sm:$0xff] }
  0x60   :  { %2741 = vmatmul.mubr.msk.f32.vlgmr.msra.gmra.mxu0 %vm168_vm2, %v155_v4  ;;  %2761 = vmatmul.mubr.f32.vlgmr.msra.gmra.mxu1 %v3322_v0  ;;  %v160_v47 = vld [vmem:[%s3909_s28 + $0x30] sm:$0xff]  ;;  %v161_v48 = vld [vmem:[%s3909_s28 + $0x38] sm:$0xff] }
  0x61   :  { %2775 = vmatpush3.msra.mxu0 %v3459_v2  ;;  %2763 = vmatprep.subr.mxu1 %v3322_v0 }
  0x62   :  { %2776 = vmatprep.subr.mxu0 %v3322_v0  ;;  %2764 = vmatpush3.msra.mxu1 %v3459_v2 }
  0x63   :  { %2777 = vmatpush3.msra.mxu0 %v3471_v5  ;;  %2771 = vmatprep.mubr.msk.f32.mxu1 %vm3323_vm0, %v3322_v0 }
  0x64   :  { %2778 = vmatprep.subr.mxu0 %v3322_v0  ;;  %2765 = vmatprep.subr.mxu1 %v3322_v0 }
  0x65   :  { %2779 = vmatpush3.msra.mxu0 %v3479_v6  ;;  %2766 = vmatpush3.msra.mxu1 %v3471_v5 }
  0x66   :  { %2780 = vmatprep.subr.mxu0 %v3322_v0  ;;  %2767 = vmatprep.subr.mxu1 %v3322_v0 }
  0x67   :  { %2781 = vmatpush3.msra.mxu0 %v3487_v7  ;;  %2768 = vmatpush3.msra.mxu1 %v3479_v6 }
  0x68   :  { %2796 = vmatprep.subr.mxu0 %v3322_v0  ;;  %2769 = vmatprep.subr.mxu1 %v3322_v0 }
  0x69   :  { %2770 = vmatpush3.msra.mxu1 %v3487_v7  ;;  %2743 = vmatprep.mubr.msk.f32.mxu0 %vm168_vm2, %v156_v43 }
  0x6a   :  { %2785 = vmatprep.subr.mxu1 %v3322_v0  ;;  %2744 = vmatmul.mubr.msk.f32.gmra.mxu0 %vm168_vm2, %v157_v44 }
  0x6b   :  { %2746 = vmatprep.mubr.msk.f32.mxu0 %vm168_vm2, %v158_v45 }
  0x6e   :  { %2747 = vmatmul.mubr.msk.f32.gmra.mxu0 %vm168_vm2, %v159_v46 }
  0x6f   :  { %2749 = vmatprep.mubr.msk.f32.mxu0 %vm168_vm2, %v160_v47 }
  0x72   :  { %2750 = vmatmul.mubr.msk.f32.gmra.mxu0 %vm168_vm2, %v161_v48 }
  0x73   :  { %2782 = vmatprep.mubr.msk.f32.mxu0 %vm3323_vm0, %v3322_v0 }
 0x120   :  { %v2742_v8 = vpop.f32.mrf.mxu0  ;;  %v381_v12 = vpop.f32.mrf.mxu1 }
 0x121   :  { %v269_v29 = vadd.f32 %v2742_v8, %v3515_v9 }
 0x122   :  { %v263_v10 = vpop.f32.mrf.mxu0  ;;  %v2762_v14 = vpop.f32.mrf.mxu1 }
 0x123   :  { %v264_v11 = vadd.f32 %v3515_v9, %v263_v10 }
 0x125   :  { %v385_v13 = vadd.f32 %v381_v12, %v264_v11 }
 0x127   :  { %3011 = vtanh.f32 %v385_v13  ;;  %v2566_v16 = vmul.f32 -1.442695, %v385_v13 }
 0x129   :  { %3013 = vpow2.f32 %v2566_v16 }
 0x12a   :  { %v2745_v53 = vpop.f32.mrf.mxu0 }
 0x12c   :  { %v273_v54 = vpop.f32.mrf.mxu0 }
 0x12d   :  { %v274_v59 = vadd.f32 %v3515_v9, %v273_v54 }
 0x12e   :  { %v3577_v55 = vpop.f32.mrf.mxu0 }
 0x130   :  { %v3579_v56 = vpop.f32.mrf.mxu0 }
 0x132   :  { %v3581_v57 = vpop.f32.mrf.mxu0 }
 0x134   :  { %v3012_v15 = vpop.eup %3011  ;;  %v3583_v58 = vpop.f32.mrf.mxu0 }
 0x135   :  { %395 = vrot.lane.b32.xlu0 %v3012_v15, %s3324_s23 }
 0x136   :  { %v3014_v17 = vpop.eup %3013 }
 0x137   :  { %v389_v18 = vadd.f32 1.0, %v3014_v17 }
 0x139   :  { %3015 = vrcp.f32 %v389_v18 }
 0x146   :  { %v3016_v19 = vpop.eup %3015 }
 0x147   :  { %v393_v22 = vmul.f32 0.0, %v3016_v19 }
 0x1a7   :  { %v396_v20 = vpop.permute.xlu0 %395 }
 0x1a8   :  { %v398_v21 = vmul.f32 %v3016_v19, %v396_v20 }
 0x1aa   :  { %400 = vrot.lane.b32.xlu0 %v398_v21, %s3325_s4 }
 0x21c   :  { %v401_v23 = vpop.permute.xlu0 %400 }
 0x21d   :  { %v403_v24 = vadd.f32 %v401_v23, %v393_v22 }
 0x21f   :  { %3017 = vtanh.f32 %v403_v24 }
 0x22c   :  { %v3018_v25 = vpop.eup %3017 }
 0x22d   :  { %406 = vrot.lane.b32.xlu1 %v3018_v25, %s3324_s23 }
 0x29f   :  { %v407_v26 = vpop.permute.xlu1 %406 }
 0x2a0   :  { %v409_v27 = vmul.f32 %v3016_v19, %v407_v26  ;;  %v279_v19 = vadd.f32 %v2745_v53, %v3515_v9 }
 0x2a2   :  { %411 = vrot.lane.b32.xlu1 %v409_v27, %s3325_s4 }
 0x314   :  { %v412_v28 = vpop.permute.xlu1 %411 }
 0x315   :  { %414 = vst.msk [vmem:[#allocation3] sm:$0xff] %vm311_vm3, %v412_v28  ;;  %2772 = vmatmul.mubr.msk.f32.vlgmr.msra.gmra.mxu1 %vm311_vm3, %v412_v28 }
 0x316   :  { %2786 = vmatpush3.msra.mxu1 %v3459_v2  ;;  %2793 = vmatprep.mubr.msk.f32.mxu1 %vm3323_vm0, %v3322_v0 }
 0x317   :  { %2787 = vmatprep.subr.mxu1 %v3322_v0 }
 0x318   :  { %2788 = vmatpush3.msra.mxu1 %v3471_v5 }
 0x319   :  { %2789 = vmatprep.subr.mxu1 %v3322_v0 }
 0x31a   :  { %2790 = vmatpush3.msra.mxu1 %v3479_v6 }
 0x31b   :  { %2791 = vmatprep.subr.mxu1 %v3322_v0 }
 0x31c   :  { %2792 = vmatpush3.msra.mxu1 %v3487_v7 }
 0x31d   :  { %2807 = vmatprep.subr.mxu1 %v3322_v0 }
 0x3d5   :  { %v485_v30 = vpop.f32.mrf.mxu1 }
 0x3d6   :  { %v489_v31 = vadd.f32 %v485_v30, %v269_v29 }
 0x3d7   :  { %v2773_v32 = vpop.f32.mrf.mxu1 }
 0x3d8   :  { %3019 = vtanh.f32 %v489_v31  ;;  %v2568_v34 = vmul.f32 -1.442695, %v489_v31 }
 0x3da   :  { %3021 = vpow2.f32 %v2568_v34 }
 0x3e5   :  { %v3020_v33 = vpop.eup %3019 }
 0x3e6   :  { %499 = vrot.lane.b32.xlu0 %v3020_v33, %s3324_s23 }
 0x3e7   :  { %v3022_v35 = vpop.eup %3021 }
 0x3e8   :  { %v493_v36 = vadd.f32 1.0, %v3022_v35 }
 0x3ea   :  { %3023 = vrcp.f32 %v493_v36 }
 0x3f7   :  { %v3024_v37 = vpop.eup %3023 }
 0x3f8   :  { %v497_v40 = vmul.f32 %v3024_v37, %v403_v24 }
 0x458   :  { %v500_v38 = vpop.permute.xlu0 %499 }
 0x459   :  { %v502_v39 = vmul.f32 %v3024_v37, %v500_v38 }
 0x45b   :  { %504 = vrot.lane.b32.xlu1 %v502_v39, %s3325_s4 }
 0x4cd   :  { %v505_v41 = vpop.permute.xlu1 %504 }
 0x4ce   :  { %v507_v42 = vadd.f32 %v505_v41, %v497_v40 }
 0x4d0   :  { %3025 = vtanh.f32 %v507_v42 }
 0x4dd   :  { %v3026_v49 = vpop.eup %3025 }
 0x4de   :  { %510 = vrot.lane.b32.xlu0 %v3026_v49, %s3324_s23 }
 0x550   :  { %v511_v50 = vpop.permute.xlu0 %510 }
 0x551   :  { %v513_v51 = vmul.f32 %v3024_v37, %v511_v50  ;;  %v284_v37 = vadd.f32 %v3515_v9, %v3579_v56 }
 0x553   :  { %515 = vrot.lane.b32.xlu1 %v513_v51, %s3325_s4 }
 0x5c5   :  { %v516_v52 = vpop.permute.xlu1 %515 }
 0x5c6   :  { %519 = vst.msk [vmem:[#allocation3 + $0x8] sm:$0xff] %vm311_vm3, %v516_v52  ;;  %2783 = vmatmul.mubr.msk.f32.vlgmr.msra.gmra.mxu0 %vm311_vm3, %v516_v52 }
 0x5c7   :  { %2797 = vmatpush3.msra.mxu0 %v3459_v2  ;;  %2804 = vmatprep.mubr.msk.f32.mxu0 %vm3323_vm0, %v3322_v0 }
 0x5c8   :  { %2798 = vmatprep.subr.mxu0 %v3322_v0 }
 0x5c9   :  { %2799 = vmatpush3.msra.mxu0 %v3471_v5 }
 0x5ca   :  { %2800 = vmatprep.subr.mxu0 %v3322_v0 }
 0x5cb   :  { %2801 = vmatpush3.msra.mxu0 %v3479_v6 }
 0x5cc   :  { %2802 = vmatprep.subr.mxu0 %v3322_v0 }
 0x5cd   :  { %2803 = vmatpush3.msra.mxu0 %v3487_v7 }
 0x5ce   :  { %2818 = vmatprep.subr.mxu0 %v3322_v0 }
 0x686   :  { %v590_v60 = vpop.f32.mrf.mxu0 }
 0x687   :  { %v594_v61 = vadd.f32 %v590_v60, %v274_v59 }
 0x688   :  { %v2784_v62 = vpop.f32.mrf.mxu0 }
 0x689   :  { %3027 = vtanh.f32 %v594_v61  ;;  %v2570_v1 = vmul.f32 -1.442695, %v594_v61 }
 0x68b   :  { %3029 = vpow2.f32 %v2570_v1 }
 0x696   :  { %v3028_v63 = vpop.eup %3027 }
 0x697   :  { %604 = vrot.lane.b32.xlu0 %v3028_v63, %s3324_s23 }
 0x698   :  { %v3030_v3 = vpop.eup %3029 }
 0x699   :  { %v598_v4 = vadd.f32 1.0, %v3030_v3 }
 0x69b   :  { %3031 = vrcp.f32 %v598_v4 }
 0x6a8   :  { %v3032_v8 = vpop.eup %3031 }
 0x6a9   :  { %v602_v12 = vmul.f32 %v3032_v8, %v507_v42 }
 0x709   :  { %v605_v10 = vpop.permute.xlu0 %604 }
 0x70a   :  { %v607_v11 = vmul.f32 %v3032_v8, %v605_v10 }
 0x70c   :  { %609 = vrot.lane.b32.xlu1 %v607_v11, %s3325_s4 }
 0x77e   :  { %v610_v13 = vpop.permute.xlu1 %609 }
 0x77f   :  { %v612_v14 = vadd.f32 %v610_v13, %v602_v12 }
 0x781   :  { %3033 = vtanh.f32 %v612_v14 }
 0x78e   :  { %v3034_v15 = vpop.eup %3033 }
 0x78f   :  { %615 = vrot.lane.b32.xlu0 %v3034_v15, %s3324_s23  ;;  %v1159_v15 = vld [vmem:[#allocation3] sm:$0xff] }
 0x801   :  { %v616_v16 = vpop.permute.xlu0 %615 }
 0x802   :  { %v618_v17 = vmul.f32 %v3032_v8, %v616_v16  ;;  %v1153_v8 = vld [vmem:[%s3892_s5 + $0x18] sm:$0xff]  ;;  %v1151_v16 = vld [vmem:[%s3892_s5 + $0x8] sm:$0xff] }
 0x804   :  { %620 = vrot.lane.b32.xlu1 %v618_v17, %s3325_s4  ;;  %v1150_v17 = vld [vmem:[%s3892_s5] sm:$0xff] }
 0x876   :  { %v621_v18 = vpop.permute.xlu1 %620 }
 0x877   :  { %624 = vst.msk [vmem:[#allocation3 + $0x10] sm:$0xff] %vm311_vm3, %v621_v18  ;;  %2794 = vmatmul.mubr.msk.f32.vlgmr.msra.gmra.mxu1 %vm311_vm3, %v621_v18  ;;  %v1160_v18 = vld [vmem:[#allocation3 + $0x8] sm:$0xff] }
 0x878   :  { %2808 = vmatpush3.msra.mxu1 %v3459_v2  ;;  %2815 = vmatprep.mubr.msk.f32.mxu1 %vm3323_vm0, %v3322_v0 }
 0x879   :  { %2809 = vmatprep.subr.mxu1 %v3322_v0 }
 0x87a   :  { %2810 = vmatpush3.msra.mxu1 %v3471_v5 }
 0x87b   :  { %2811 = vmatprep.subr.mxu1 %v3322_v0 }
 0x87c   :  { %2812 = vmatpush3.msra.mxu1 %v3479_v6 }
 0x87d   :  { %2813 = vmatprep.subr.mxu1 %v3322_v0 }
 0x87e   :  { %2814 = vmatpush3.msra.mxu1 %v3487_v7 }
 0x87f   :  { %2829 = vmatprep.subr.mxu1 %v3322_v0 }
 0x937   :  { %v695_v20 = vpop.f32.mrf.mxu1 }
 0x938   :  { %v699_v21 = vadd.f32 %v695_v20, %v279_v19  ;;  %v1161_v19 = vld [vmem:[#allocation3 + $0x10] sm:$0xff] }
 0x939   :  { %v2795_v22 = vpop.f32.mrf.mxu1 }
 0x93a   :  { %3035 = vtanh.f32 %v699_v21  ;;  %v2572_v24 = vmul.f32 -1.442695, %v699_v21 }
 0x93c   :  { %3037 = vpow2.f32 %v2572_v24 }
 0x947   :  { %v3036_v23 = vpop.eup %3035 }
 0x948   :  { %709 = vrot.lane.b32.xlu0 %v3036_v23, %s3324_s23  ;;  %v294_v23 = vadd.f32 %v3515_v9, %v3583_v58 }
 0x949   :  { %v3038_v25 = vpop.eup %3037 }
 0x94a   :  { %v703_v26 = vadd.f32 1.0, %v3038_v25 }
 0x94c   :  { %3039 = vrcp.f32 %v703_v26 }
 0x959   :  { %v3040_v27 = vpop.eup %3039 }
 0x95a   :  { %v707_v30 = vmul.f32 %v3040_v27, %v612_v14  ;;  %v1152_v14 = vld [vmem:[%s3892_s5 + $0x10] sm:$0xff] }
 0x9ba   :  { %v710_v28 = vpop.permute.xlu0 %709 }
 0x9bb   :  { %v712_v29 = vmul.f32 %v3040_v27, %v710_v28 }
 0x9bd   :  { %714 = vrot.lane.b32.xlu1 %v712_v29, %s3325_s4 }
 0xa2f   :  { %v715_v31 = vpop.permute.xlu1 %714 }
 0xa30   :  { %v717_v32 = vadd.f32 %v715_v31, %v707_v30 }
 0xa32   :  { %3041 = vtanh.f32 %v717_v32 }
 0xa3f   :  { %v3042_v33 = vpop.eup %3041 }
 0xa40   :  { %720 = vrot.lane.b32.xlu0 %v3042_v33, %s3324_s23 }
 0xab2   :  { %v721_v34 = vpop.permute.xlu0 %720 }
 0xab3   :  { %v723_v35 = vmul.f32 %v3040_v27, %v721_v34 }
 0xab5   :  { %725 = vrot.lane.b32.xlu1 %v723_v35, %s3325_s4 }
 0xb27   :  { %v726_v36 = vpop.permute.xlu1 %725 }
 0xb28   :  { %729 = vst.msk [vmem:[#allocation3 + $0x18] sm:$0xff] %vm311_vm3, %v726_v36  ;;  %2805 = vmatmul.mubr.msk.f32.vlgmr.msra.gmra.mxu0 %vm311_vm3, %v726_v36 }
 0xb29   :  { %2819 = vmatpush3.msra.mxu0 %v3459_v2  ;;  %2826 = vmatprep.mubr.msk.f32.mxu0 %vm3323_vm0, %v3322_v0 }
 0xb2a   :  { %2820 = vmatprep.subr.mxu0 %v3322_v0 }
 0xb2b   :  { %2821 = vmatpush3.msra.mxu0 %v3471_v5 }
 0xb2c   :  { %2822 = vmatprep.subr.mxu0 %v3322_v0 }
 0xb2d   :  { %2823 = vmatpush3.msra.mxu0 %v3479_v6 }
 0xb2e   :  { %2824 = vmatprep.subr.mxu0 %v3322_v0 }
 0xb2f   :  { %2825 = vmatpush3.msra.mxu0 %v3487_v7  ;;  %v1162_v20 = vld [vmem:[#allocation3 + $0x18] sm:$0xff] }
 0xb30   :  { %2840 = vmatprep.subr.mxu0 %v1153_v8 }
 0xbe8   :  { %v800_v38 = vpop.f32.mrf.mxu0 }
 0xbe9   :  { %v804_v39 = vadd.f32 %v800_v38, %v284_v37  ;;  %v3671_v37 = vld [vmem:[#allocation9 + $0x18] sm:$0xff]  ;;  %v3674_v38 = vld [vmem:[#allocation9 + $0x10] sm:$0xff] }
 0xbea   :  { %v2806_v40 = vpop.f32.mrf.mxu0 }
 0xbeb   :  { %3043 = vtanh.f32 %v804_v39  ;;  %v2574_v42 = vmul.f32 -1.442695, %v804_v39  ;;  %v3678_v39 = vld [vmem:[#allocation9 + $0x8] sm:$0xff]  ;;  %v3682_v40 = vld [vmem:[#allocation9] sm:$0xff] }
 0xbed   :  { %3045 = vpow2.f32 %v2574_v42 }
 0xbf8   :  { %v3044_v41 = vpop.eup %3043 }
 0xbf9   :  { %814 = vrot.lane.b32.xlu0 %v3044_v41, %s3324_s23 }
 0xbfa   :  { %v3046_v43 = vpop.eup %3045 }
 0xbfb   :  { %v808_v44 = vadd.f32 1.0, %v3046_v43 }
 0xbfd   :  { %3047 = vrcp.f32 %v808_v44 }
 0xc0a   :  { %v3048_v45 = vpop.eup %3047 }
 0xc0b   :  { %v812_v48 = vmul.f32 %v3048_v45, %v717_v32 }
 0xc6b   :  { %v815_v46 = vpop.permute.xlu0 %814 }
 0xc6c   :  { %v817_v47 = vmul.f32 %v3048_v45, %v815_v46 }
 0xc6e   :  { %819 = vrot.lane.b32.xlu1 %v817_v47, %s3325_s4 }
 0xce0   :  { %v820_v49 = vpop.permute.xlu1 %819 }
 0xce1   :  { %v822_v50 = vadd.f32 %v820_v49, %v812_v48 }
 0xce3   :  { %3049 = vtanh.f32 %v822_v50 }
 0xcf0   :  { %v3050_v51 = vpop.eup %3049 }
 0xcf1   :  { %825 = vrot.lane.b32.xlu0 %v3050_v51, %s3324_s23  ;;  %v3719_v51 = vld [vmem:[%s3894_s7] ss:$0 sm:$0xff] }
 0xd63   :  { %v826_v52 = vpop.permute.xlu0 %825 }
 0xd64   :  { %v828_v53 = vmul.f32 %v3048_v45, %v826_v52  ;;  %v299_v45 = vadd.f32 %v3581_v57, %v3515_v9 }
 0xd66   :  { %830 = vrot.lane.b32.xlu1 %v828_v53, %s3325_s4 }
 0xdd8   :  { %v831_v54 = vpop.permute.xlu1 %830 }
 0xdd9   :  { %834 = vst.msk [vmem:[#allocation3 + $0x20] sm:$0xff] %vm311_vm3, %v831_v54  ;;  %2816 = vmatmul.mubr.msk.f32.vlgmr.msra.gmra.mxu1 %vm311_vm3, %v831_v54 }
 0xdda   :  { %2830 = vmatpush3.msra.mxu1 %v3459_v2  ;;  %2837 = vmatprep.mubr.msk.f32.mxu1 %vm3323_vm0, %v3322_v0  ;;  %v289_v2 = vadd.f32 %v3577_v55, %v3515_v9 }
 0xddb   :  { %2831 = vmatprep.subr.mxu1 %v3322_v0 }
 0xddc   :  { %2832 = vmatpush3.msra.mxu1 %v3471_v5 }
 0xddd   :  { %2833 = vmatprep.subr.mxu1 %v3322_v0 }
 0xdde   :  { %2834 = vmatpush3.msra.mxu1 %v3479_v6 }
 0xddf   :  { %2835 = vmatprep.subr.mxu1 %v3322_v0 }
 0xde0   :  { %2836 = vmatpush3.msra.mxu1 %v3487_v7  ;;  %v1163_v21 = vld [vmem:[#allocation3 + $0x20] sm:$0xff] }
 0xde1   :  { %2860 = vmatprep.subr.mxu1 %v3322_v0 }
 0xe99   :  { %v905_v56 = vpop.f32.mrf.mxu1 }
 0xe9a   :  { %v909_v59 = vadd.f32 %v905_v56, %v289_v2 }
 0xe9b   :  { %v2817_v60 = vpop.f32.mrf.mxu1 }
 0xe9c   :  { %3051 = vtanh.f32 %v909_v59  ;;  %v2576_v5 = vmul.f32 -1.442695, %v909_v59 }
 0xe9e   :  { %3053 = vpow2.f32 %v2576_v5 }
 0xea9   :  { %v3052_v61 = vpop.eup %3051 }
 0xeaa   :  { %919 = vrot.lane.b32.xlu0 %v3052_v61, %s3324_s23 }
 0xeab   :  { %v3054_v62 = vpop.eup %3053 }
 0xeac   :  { %v913_v6 = vadd.f32 1.0, %v3054_v62 }
 0xeae   :  { %3055 = vrcp.f32 %v913_v6 }
 0xebb   :  { %v3056_v63 = vpop.eup %3055 }
 0xebc   :  { %v917_v3 = vmul.f32 %v3056_v63, %v822_v50 }
 0xf1c   :  { %v920_v1 = vpop.permute.xlu0 %919 }
 0xf1d   :  { %v922_v7 = vmul.f32 %v3056_v63, %v920_v1 }
 0xf1f   :  { %924 = vrot.lane.b32.xlu1 %v922_v7, %s3325_s4 }
 0xf91   :  { %v925_v4 = vpop.permute.xlu1 %924 }
 0xf92   :  { %v927_v55 = vadd.f32 %v925_v4, %v917_v3 }
 0xf94   :  { %3057 = vtanh.f32 %v927_v55 }
 0xfa1   :  { %v3058_v10 = vpop.eup %3057 }
 0xfa2   :  { %930 = vrot.lane.b32.xlu0 %v3058_v10, %s3324_s23 }
0x1014   :  { %v931_v11 = vpop.permute.xlu0 %930 }
0x1015   :  { %v933_v12 = vmul.f32 %v3056_v63, %v931_v11 }
0x1017   :  { %935 = vrot.lane.b32.xlu1 %v933_v12, %s3325_s4 }
0x1089   :  { %v936_v13 = vpop.permute.xlu1 %935 }
0x108a   :  { %939 = vst.msk [vmem:[#allocation3 + $0x28] sm:$0xff] %vm311_vm3, %v936_v13  ;;  %2827 = vmatmul.mubr.msk.f32.vlgmr.msra.gmra.mxu0 %vm311_vm3, %v936_v13 }
0x108b   :  { %2841 = vmatpush3.msra.mxu0 %v1153_v8  ;;  %2848 = vmatprep.mubr.msk.f32.mxu0 %vm311_vm3, %v1159_v15 }
0x108c   :  { %2842 = vmatprep.subr.mxu0 %v1152_v14 }
0x108d   :  { %2843 = vmatpush3.msra.mxu0 %v1152_v14 }
0x108e   :  { %2844 = vmatprep.subr.mxu0 %v1151_v16 }
0x108f   :  { %2845 = vmatpush3.msra.mxu0 %v1151_v16 }
0x1090   :  { %2846 = vmatprep.subr.mxu0 %v1150_v17 }
0x1091   :  { %2847 = vmatpush3.msra.mxu0 %v1150_v17  ;;  %v1164_v22 = vld [vmem:[#allocation3 + $0x28] sm:$0xff] }
0x1092   :  { %2849 = vmatmul.mubr.msk.f32.vlgmr.msra.gmra.mxu0 %vm311_vm3, %v1160_v18  ;;  %2882 = vmatprep.subr.mxu0 %v3322_v0 }
0x1093   :  { %2851 = vmatprep.mubr.msk.f32.mxu0 %vm311_vm3, %v1161_v19  ;;  %2883 = vmatpush3.msra.mxu0 %v3671_v37 }
0x1094   :  { %2884 = vmatprep.subr.mxu0 %v3322_v0 }
0x1095   :  { %2885 = vmatpush3.msra.mxu0 %v3674_v38 }
0x1096   :  { %2852 = vmatmul.mubr.msk.f32.gmra.mxu0 %vm311_vm3, %v1162_v20  ;;  %2886 = vmatprep.subr.mxu0 %v3322_v0 }
0x1097   :  { %2854 = vmatprep.mubr.msk.f32.mxu0 %vm311_vm3, %v1163_v21  ;;  %2887 = vmatpush3.msra.mxu0 %v3678_v39 }
0x1098   :  { %2888 = vmatprep.subr.mxu0 %v3322_v0 }
0x1099   :  { %2889 = vmatpush3.msra.mxu0 %v3682_v40 }
0x109a   :  { %2855 = vmatmul.mubr.msk.f32.gmra.mxu0 %vm311_vm3, %v1164_v22  ;;  %2904 = vmatprep.subr.mxu0 %v3322_v0 }
0x114a   :  { %v1010_v24 = vpop.f32.mrf.mxu0 }
0x114b   :  { %v1014_v25 = vadd.f32 %v1010_v24, %v294_v23 }
0x114c   :  { %v2828_v26 = vpop.f32.mrf.mxu0 }
0x114d   :  { %3059 = vtanh.f32 %v1014_v25  ;;  %v2578_v28 = vmul.f32 -1.442695, %v1014_v25 }
0x114f   :  { %3061 = vpow2.f32 %v2578_v28 }
0x1152   :  { %v3714_v46 = vpop.f32.mrf.mxu0 }
0x1153   :  { %v1269_v21 = vadd.f32 %v3714_v46, %v3719_v51 }
0x1154   :  { %v1263_v50 = vpop.f32.mrf.mxu0 }
0x1155   :  { %v1264_v52 = vadd.f32 %v3719_v51, %v1263_v50 }
0x115a   :  { %v3060_v27 = vpop.eup %3059 }
0x115b   :  { %1024 = vrot.lane.b32.xlu0 %v3060_v27, %s3324_s23 }
0x115c   :  { %v3062_v29 = vpop.eup %3061 }
0x115d   :  { %v1018_v30 = vadd.f32 1.0, %v3062_v29 }
0x115f   :  { %3063 = vrcp.f32 %v1018_v30 }
0x116c   :  { %v3064_v31 = vpop.eup %3063 }
0x116d   :  { %v1022_v34 = vmul.f32 %v3064_v31, %v927_v55 }
0x11cd   :  { %v1025_v32 = vpop.permute.xlu0 %1024 }
0x11ce   :  { %v1027_v33 = vmul.f32 %v3064_v31, %v1025_v32 }
0x11d0   :  { %1029 = vrot.lane.b32.xlu1 %v1027_v33, %s3325_s4 }
0x1242   :  { %v1030_v35 = vpop.permute.xlu1 %1029 }
0x1243   :  { %v3667_v58 = vadd.f32 %v1030_v35, %v1022_v34 }
0x1245   :  { %3065 = vtanh.f32 %v3667_v58 }
0x1252   :  { %v3066_v36 = vpop.eup %3065 }
0x1253   :  { %1035 = vrot.lane.b32.xlu0 %v3066_v36, %s3324_s23 }
0x12c5   :  { %v1036_v41 = vpop.permute.xlu0 %1035 }
0x12c6   :  { %v1038_v42 = vmul.f32 %v3064_v31, %v1036_v41 }
0x12c8   :  { %1040 = vrot.lane.b32.xlu1 %v1038_v42, %s3325_s4 }
0x133a   :  { %v1041_v43 = vpop.permute.xlu1 %1040 }
0x133b   :  { %1044 = vst.msk [vmem:[#allocation3 + $0x30] sm:$0xff] %vm311_vm3, %v1041_v43  ;;  %2838 = vmatmul.mubr.msk.f32.vlgmr.msra.gmra.mxu1 %vm311_vm3, %v1041_v43 }
0x133c   :  { %2861 = vmatpush3.msra.mxu1 %v3671_v37  ;;  %2868 = vmatprep.mubr.msk.f32.mxu1 %vm3323_vm0, %v3322_v0 }
0x133d   :  { %2862 = vmatprep.subr.mxu1 %v3322_v0 }
0x133e   :  { %2863 = vmatpush3.msra.mxu1 %v3674_v38 }
0x133f   :  { %2864 = vmatprep.subr.mxu1 %v3322_v0 }
0x1340   :  { %2865 = vmatpush3.msra.mxu1 %v3678_v39 }
0x1341   :  { %2866 = vmatprep.subr.mxu1 %v3322_v0 }
0x1342   :  { %2867 = vmatpush3.msra.mxu1 %v3682_v40  ;;  %v1165_v44 = vld [vmem:[#allocation3 + $0x30] sm:$0xff] }
0x1343   :  { %2869 = vmatmul.mubr.f32.vlgmr.msra.gmra.mxu1 %v3322_v0  ;;  %2857 = vmatprep.mubr.msk.f32.mxu0 %vm311_vm3, %v1165_v44  ;;  %v2853_v44 = vpop.f32.mrf.mxu0 }
0x1344   :  { %2871 = vmatprep.subr.mxu1 %v3322_v0  ;;  %2879 = vmatprep.mubr.msk.f32.mxu1 %vm3323_vm0, %v3322_v0 }
0x1345   :  { %2872 = vmatpush3.msra.mxu1 %v3671_v37 }
0x1346   :  { %2873 = vmatprep.subr.mxu1 %v3322_v0 }
0x1347   :  { %2874 = vmatpush3.msra.mxu1 %v3674_v38 }
0x1348   :  { %2875 = vmatprep.subr.mxu1 %v3322_v0 }
0x1349   :  { %2876 = vmatpush3.msra.mxu1 %v3678_v39 }
0x134a   :  { %2877 = vmatprep.subr.mxu1 %v3322_v0 }
0x134b   :  { %2878 = vmatpush3.msra.mxu1 %v3682_v40 }
0x134c   :  { %2893 = vmatprep.subr.mxu1 %v3322_v0 }
0x13fb   :  { %v1115_v47 = vpop.f32.mrf.mxu1 }
0x13fc   :  { %v1119_v48 = vadd.f32 %v1115_v47, %v299_v45  ;;  %v1273_v45 = vpop.f32.mrf.mxu0 }
0x13fd   :  { %v2839_v49 = vpop.f32.mrf.mxu1  ;;  %v1274_v50 = vadd.f32 %v3719_v51, %v1273_v45 }
0x13fe   :  { %v2580_v3 = vmul.f32 -1.442695, %v1119_v48  ;;  %v3763_v46 = vpop.f32.mrf.mxu0 }
0x1400   :  { %v3765_v47 = vpop.f32.mrf.mxu0 }
0x1403   :  { %v1377_v53 = vpop.f32.mrf.mxu1 }
0x1404   :  { %v1381_v54 = vadd.f32 %v1377_v53, %v1264_v52 }
0x1405   :  { %v2870_v2 = vpop.f32.mrf.mxu1 }
0x1406   :  { %3067 = vtanh.f32 %v1381_v54  ;;  %v2590_v9 = vmul.f32 -1.442695, %v1381_v54 }
0x1408   :  { %3069 = vpow2.f32 %v2590_v9 }
0x1413   :  { %v3068_v56 = vpop.eup %3067 }
0x1414   :  { %1391 = vrot.lane.b32.xlu0 %v3068_v56, %s3324_s23 }
0x1415   :  { %v3070_v57 = vpop.eup %3069 }
0x1416   :  { %v1385_v59 = vadd.f32 1.0, %v3070_v57 }
0x1418   :  { %3071 = vrcp.f32 %v1385_v59 }
0x1425   :  { %v3072_v60 = vpop.eup %3071 }
0x1426   :  { %v1389_v62 = vmul.f32 0.0, %v3072_v60 }
0x1486   :  { %v1392_v61 = vpop.permute.xlu0 %1391 }
0x1487   :  { %v1394_v5 = vmul.f32 %v3072_v60, %v1392_v61 }
0x1489   :  { %1396 = vrot.lane.b32.xlu1 %v1394_v5, %s3325_s4 }
0x14fb   :  { %v1397_v6 = vpop.permute.xlu1 %1396 }
0x14fc   :  { %v1399_v63 = vadd.f32 %v1397_v6, %v1389_v62 }
0x14fe   :  { %3073 = vtanh.f32 %v1399_v63 }
0x14ff   :  { %3075 = vtanh.f32 %v1119_v48 }
0x1500   :  { %3077 = vpow2.f32 %v2580_v3 }
0x150b   :  { %v3074_v1 = vpop.eup %3073 }
0x150c   :  { %1402 = vrot.lane.b32.xlu0 %v3074_v1, %s3324_s23  ;;  %v3076_v7 = vpop.eup %3075 }
0x150d   :  { %v3078_v4 = vpop.eup %3077 }
0x150e   :  { %v1123_v55 = vadd.f32 1.0, %v3078_v4  ;;  %v1279_v4 = vadd.f32 %v2853_v44, %v3719_v51 }
0x1510   :  { %1129 = vrot.lane.b32.xlu0 %v3076_v7, %s3324_s23  ;;  %3079 = vrcp.f32 %v1123_v55 }
0x151d   :  { %v3080_v11 = vpop.eup %3079 }
0x151e   :  { %v1127_v15 = vmul.f32 %v3080_v11, %v3667_v58 }
0x157e   :  { %v1403_v8 = vpop.permute.xlu0 %1402 }
0x157f   :  { %v1405_v10 = vmul.f32 %v3072_v60, %v1403_v8 }
0x1581   :  { %1408 = vrot.lane.b32.xlu1 %v1405_v10, %s3325_s4 }
0x1582   :  { %v1130_v12 = vpop.permute.xlu0 %1129 }
0x1583   :  { %v1132_v13 = vmul.f32 %v3080_v11, %v1130_v12 }
0x1585   :  { %1134 = vrot.lane.b32.xlu0 %v1132_v13, %s3325_s4 }
0x15f3   :  { %v1409_v14 = vpop.permute.xlu1 %1408 }
0x15f4   :  { %2880 = vmatmul.mubr.msk.f32.vlgmr.msra.gmra.mxu1 %vm311_vm3, %v1409_v14 }
0x15f5   :  { %2894 = vmatpush3.msra.mxu1 %v3671_v37  ;;  %2901 = vmatprep.mubr.msk.f32.mxu1 %vm3323_vm0, %v3322_v0 }
0x15f6   :  { %2895 = vmatprep.subr.mxu1 %v3322_v0 }
0x15f7   :  { %v1135_v16 = vpop.permute.xlu0 %1134  ;;  %2896 = vmatpush3.msra.mxu1 %v3674_v38 }
0x15f8   :  { %v1137_v17 = vadd.f32 %v1135_v16, %v1127_v15  ;;  %2897 = vmatprep.subr.mxu1 %v3322_v0 }
0x15f9   :  { %2898 = vmatpush3.msra.mxu1 %v3678_v39 }
0x15fa   :  { %3081 = vtanh.f32 %v1137_v17  ;;  %2899 = vmatprep.subr.mxu1 %v3322_v0 }
0x15fb   :  { %2900 = vmatpush3.msra.mxu1 %v3682_v40 }
0x15fc   :  { %2915 = vmatprep.subr.mxu1 %v3322_v0 }
0x1607   :  { %v3082_v18 = vpop.eup %3081 }
0x1608   :  { %1140 = vrot.lane.b32.xlu0 %v3082_v18, %s3324_s23 }
0x167a   :  { %v1141_v19 = vpop.permute.xlu0 %1140 }
0x167b   :  { %v1143_v20 = vmul.f32 %v3080_v11, %v1141_v19 }
0x167d   :  { %1145 = vrot.lane.b32.xlu0 %v1143_v20, %s3325_s4 }
0x16b4   :  { %v1478_v22 = vpop.f32.mrf.mxu1 }
0x16b5   :  { %v1482_v23 = vadd.f32 %v1478_v22, %v1269_v21 }
0x16b6   :  { %v2881_v24 = vpop.f32.mrf.mxu1 }
0x16b7   :  { %3083 = vtanh.f32 %v1482_v23  ;;  %v2592_v28 = vmul.f32 -1.442695, %v1482_v23 }
0x16b9   :  { %3085 = vpow2.f32 %v2592_v28 }
0x16c4   :  { %v3084_v25 = vpop.eup %3083 }
0x16c5   :  { %1492 = vrot.lane.b32.xlu1 %v3084_v25, %s3324_s23  ;;  %v1284_v25 = vadd.f32 %v3719_v51, %v3765_v47 }
0x16c6   :  { %v3086_v29 = vpop.eup %3085 }
0x16c7   :  { %v1486_v30 = vadd.f32 1.0, %v3086_v29 }
0x16c9   :  { %3087 = vrcp.f32 %v1486_v30 }
0x16d6   :  { %v3088_v31 = vpop.eup %3087 }
0x16d7   :  { %v1490_v34 = vmul.f32 %v3088_v31, %v1399_v63 }
0x16ef   :  { %v1146_v26 = vpop.permute.xlu0 %1145 }
0x16f0   :  { %1149 = vst.msk [vmem:[#allocation3 + $0x38] sm:$0xff] %vm311_vm3, %v1146_v26 }
0x16f7   :  { %v1166_v27 = vld [vmem:[#allocation3 + $0x38] sm:$0xff] }
0x16f8   :  { %2858 = vmatmul.mubr.msk.f32.gmra.mxu0 %vm311_vm3, %v1166_v27 }
0x16f9   :  { %2890 = vmatprep.mubr.msk.f32.mxu0 %vm3323_vm0, %v3322_v0 }
0x1737   :  { %v1493_v32 = vpop.permute.xlu1 %1492 }
0x1738   :  { %v1495_v33 = vmul.f32 %v3088_v31, %v1493_v32 }
0x173a   :  { %1497 = vrot.lane.b32.xlu1 %v1495_v33, %s3325_s4 }
0x17ac   :  { %v1498_v35 = vpop.permute.xlu1 %1497 }
0x17ad   :  { %v1500_v58 = vadd.f32 %v1498_v35, %v1490_v34 }
0x17af   :  { %3089 = vtanh.f32 %v1500_v58 }
0x17b8   :  { %v3767_v48 = vpop.f32.mrf.mxu0 }
0x17ba   :  { %v3769_v49 = vpop.f32.mrf.mxu0 }
0x17bc   :  { %v3090_v36 = vpop.eup %3089 }
0x17bd   :  { %1503 = vrot.lane.b32.xlu1 %v3090_v36, %s3324_s23 }
0x182f   :  { %v1504_v41 = vpop.permute.xlu1 %1503 }
0x1830   :  { %v1506_v42 = vmul.f32 %v3088_v31, %v1504_v41 }
0x1832   :  { %1509 = vrot.lane.b32.xlu1 %v1506_v42, %s3325_s4 }
0x18a4   :  { %v1510_v43 = vpop.permute.xlu1 %1509 }
0x18a5   :  { %2891 = vmatmul.mubr.msk.f32.vlgmr.msra.gmra.mxu0 %vm311_vm3, %v1510_v43 }
0x18a6   :  { %2905 = vmatpush3.msra.mxu0 %v3671_v37  ;;  %2912 = vmatprep.mubr.msk.f32.mxu0 %vm3323_vm0, %v3322_v0 }
0x18a7   :  { %2906 = vmatprep.subr.mxu0 %v3322_v0 }
0x18a8   :  { %2907 = vmatpush3.msra.mxu0 %v3674_v38 }
0x18a9   :  { %2908 = vmatprep.subr.mxu0 %v3322_v0 }
0x18aa   :  { %2909 = vmatpush3.msra.mxu0 %v3678_v39 }
0x18ab   :  { %2910 = vmatprep.subr.mxu0 %v3322_v0 }
0x18ac   :  { %2911 = vmatpush3.msra.mxu0 %v3682_v40 }
0x18ad   :  { %2926 = vmatprep.subr.mxu0 %v3322_v0 }
0x1965   :  { %v1579_v52 = vpop.f32.mrf.mxu0 }
0x1966   :  { %v1583_v53 = vadd.f32 %v1579_v52, %v1274_v50 }
0x1967   :  { %v2892_v54 = vpop.f32.mrf.mxu0 }
0x1968   :  { %3091 = vtanh.f32 %v1583_v53  ;;  %v2594_v56 = vmul.f32 -1.442695, %v1583_v53 }
0x196a   :  { %3093 = vpow2.f32 %v2594_v56 }
0x1975   :  { %v3092_v2 = vpop.eup %3091 }
0x1976   :  { %1593 = vrot.lane.b32.xlu0 %v3092_v2, %s3324_s23 }
0x1977   :  { %v3094_v9 = vpop.eup %3093 }
0x1978   :  { %v1587_v57 = vadd.f32 1.0, %v3094_v9 }
0x197a   :  { %3095 = vrcp.f32 %v1587_v57 }
0x1987   :  { %v3096_v59 = vpop.eup %3095 }
0x1988   :  { %v1591_v5 = vmul.f32 %v3096_v59, %v1500_v58 }
0x19e8   :  { %v1594_v60 = vpop.permute.xlu0 %1593 }
0x19e9   :  { %v1596_v61 = vmul.f32 %v3096_v59, %v1594_v60 }
0x19eb   :  { %1598 = vrot.lane.b32.xlu1 %v1596_v61, %s3325_s4 }
0x1a5d   :  { %v1599_v62 = vpop.permute.xlu1 %1598 }
0x1a5e   :  { %v1601_v6 = vadd.f32 %v1599_v62, %v1591_v5  ;;  %v1294_v62 = vadd.f32 %v3719_v51, %v3769_v49 }
0x1a60   :  { %3097 = vtanh.f32 %v1601_v6 }
0x1a6d   :  { %v3098_v63 = vpop.eup %3097 }
0x1a6e   :  { %1604 = vrot.lane.b32.xlu0 %v3098_v63, %s3324_s23 }
0x1ae0   :  { %v1605_v1 = vpop.permute.xlu0 %1604 }
0x1ae1   :  { %v1607_v7 = vmul.f32 %v3096_v59, %v1605_v1 }
0x1ae3   :  { %1610 = vrot.lane.b32.xlu1 %v1607_v7, %s3325_s4 }
0x1b55   :  { %v1611_v3 = vpop.permute.xlu1 %1610 }
0x1b56   :  { %2902 = vmatmul.mubr.msk.f32.vlgmr.msra.gmra.mxu1 %vm311_vm3, %v1611_v3 }
0x1b57   :  { %2916 = vmatpush3.msra.mxu1 %v3671_v37  ;;  %2923 = vmatprep.mubr.msk.f32.mxu1 %vm3323_vm0, %v3322_v0 }
0x1b58   :  { %2917 = vmatprep.subr.mxu1 %v3322_v0 }
0x1b59   :  { %2918 = vmatpush3.msra.mxu1 %v3674_v38 }
0x1b5a   :  { %2919 = vmatprep.subr.mxu1 %v3322_v0 }
0x1b5b   :  { %2920 = vmatpush3.msra.mxu1 %v3678_v39 }
0x1b5c   :  { %2921 = vmatprep.subr.mxu1 %v3322_v0 }
0x1b5d   :  { %2922 = vmatpush3.msra.mxu1 %v3682_v40 }
0x1b5e   :  { %2937 = vmatprep.subr.mxu1 %v3322_v0 }
0x1c16   :  { %v1680_v55 = vpop.f32.mrf.mxu1 }
0x1c17   :  { %v1684_v8 = vadd.f32 %v1680_v55, %v1279_v4 }
0x1c18   :  { %v2903_v10 = vpop.f32.mrf.mxu1 }
0x1c19   :  { %3099 = vtanh.f32 %v1684_v8  ;;  %v2596_v12 = vmul.f32 -1.442695, %v1684_v8 }
0x1c1b   :  { %3101 = vpow2.f32 %v2596_v12 }
0x1c26   :  { %v3100_v11 = vpop.eup %3099 }
0x1c27   :  { %1694 = vrot.lane.b32.xlu0 %v3100_v11, %s3324_s23 }
0x1c28   :  { %v3102_v13 = vpop.eup %3101 }
0x1c29   :  { %v1688_v14 = vadd.f32 1.0, %v3102_v13 }
0x1c2b   :  { %3103 = vrcp.f32 %v1688_v14 }
0x1c38   :  { %v3104_v15 = vpop.eup %3103 }
0x1c39   :  { %v1692_v18 = vmul.f32 %v3104_v15, %v1601_v6 }
0x1c99   :  { %v1695_v16 = vpop.permute.xlu0 %1694 }
0x1c9a   :  { %v1697_v17 = vmul.f32 %v3104_v15, %v1695_v16 }
0x1c9c   :  { %1699 = vrot.lane.b32.xlu1 %v1697_v17, %s3325_s4 }
0x1d0e   :  { %v1700_v19 = vpop.permute.xlu1 %1699 }
0x1d0f   :  { %v1702_v20 = vadd.f32 %v1700_v19, %v1692_v18  ;;  %v2114_v18 = vld [vmem:[%s3895_s8] sm:$0xff] }
0x1d10   :  { %v2113_v19 = vld [vmem:[#allocation4] sm:$0xff] }
0x1d11   :  { %3105 = vtanh.f32 %v1702_v20 }
0x1d1e   :  { %v3106_v21 = vpop.eup %3105 }
0x1d1f   :  { %1705 = vrot.lane.b32.xlu0 %v3106_v21, %s3324_s23 }
0x1d91   :  { %v1706_v22 = vpop.permute.xlu0 %1705 }
0x1d92   :  { %v1708_v23 = vmul.f32 %v3104_v15, %v1706_v22 }
0x1d94   :  { %1711 = vrot.lane.b32.xlu1 %v1708_v23, %s3325_s4 }
0x1e06   :  { %v1712_v24 = vpop.permute.xlu1 %1711 }
0x1e07   :  { %2913 = vmatmul.mubr.msk.f32.vlgmr.msra.gmra.mxu0 %vm311_vm3, %v1712_v24 }
0x1e08   :  { %2927 = vmatpush3.msra.mxu0 %v3671_v37  ;;  %2934 = vmatprep.mubr.msk.f32.mxu0 %vm3323_vm0, %v3322_v0 }
0x1e09   :  { %2928 = vmatprep.subr.mxu0 %v3322_v0 }
0x1e0a   :  { %2929 = vmatpush3.msra.mxu0 %v3674_v38 }
0x1e0b   :  { %2930 = vmatprep.subr.mxu0 %v3322_v0 }
0x1e0c   :  { %2931 = vmatpush3.msra.mxu0 %v3678_v39 }
0x1e0d   :  { %2932 = vmatprep.subr.mxu0 %v3322_v0 }
0x1e0e   :  { %2933 = vmatpush3.msra.mxu0 %v3682_v40 }
0x1e0f   :  { %2948 = vmatprep.subr.mxu0 %v3322_v0 }
0x1ec7   :  { %v1781_v26 = vpop.f32.mrf.mxu0 }
0x1ec8   :  { %v1785_v27 = vadd.f32 %v1781_v26, %v1284_v25 }
0x1ec9   :  { %v2914_v28 = vpop.f32.mrf.mxu0 }
0x1eca   :  { %3107 = vtanh.f32 %v1785_v27  ;;  %v2598_v30 = vmul.f32 -1.442695, %v1785_v27 }
0x1ecc   :  { %3109 = vpow2.f32 %v2598_v30 }
0x1ed7   :  { %v3108_v29 = vpop.eup %3107 }
0x1ed8   :  { %1795 = vrot.lane.b32.xlu0 %v3108_v29, %s3324_s23 }
0x1ed9   :  { %v3110_v31 = vpop.eup %3109 }
0x1eda   :  { %v1789_v32 = vadd.f32 1.0, %v3110_v31  ;;  %v2200_v31 = vld [vmem:[#allocation10 + $0x18] sm:$0xff] }
0x1edc   :  { %3111 = vrcp.f32 %v1789_v32  ;;  %v2199_v32 = vld [vmem:[#allocation10 + $0x10] sm:$0xff] }
0x1ee9   :  { %v3112_v33 = vpop.eup %3111 }
0x1eea   :  { %v1793_v58 = vmul.f32 %v3112_v33, %v1702_v20  ;;  %v1299_v20 = vadd.f32 %v3767_v48, %v3719_v51 }
0x1f4a   :  { %v1796_v34 = vpop.permute.xlu0 %1795 }
0x1f4b   :  { %v1798_v35 = vmul.f32 %v3112_v33, %v1796_v34 }
0x1f4d   :  { %1800 = vrot.lane.b32.xlu1 %v1798_v35, %s3325_s4  ;;  %v2198_v35 = vld [vmem:[#allocation10 + $0x8] sm:$0xff] }
0x1fbf   :  { %v1801_v36 = vpop.permute.xlu1 %1800 }
0x1fc0   :  { %v1803_v41 = vadd.f32 %v1801_v36, %v1793_v58  ;;  %v2197_v36 = vld [vmem:[#allocation10] sm:$0xff] }
0x1fc2   :  { %3113 = vtanh.f32 %v1803_v41 }
0x1fcf   :  { %v3114_v42 = vpop.eup %3113 }
0x1fd0   :  { %1806 = vrot.lane.b32.xlu0 %v3114_v42, %s3324_s23 }
0x2042   :  { %v1807_v43 = vpop.permute.xlu0 %1806 }
0x2043   :  { %v1809_v44 = vmul.f32 %v3112_v33, %v1807_v43 }
0x2045   :  { %1812 = vrot.lane.b32.xlu1 %v1809_v44, %s3325_s4  ;;  %v2289_v44 = vld [vmem:[#allocation13 + $0x18] sm:$0xff] }
0x20b7   :  { %v1813_v45 = vpop.permute.xlu1 %1812 }
0x20b8   :  { %2924 = vmatmul.mubr.msk.f32.vlgmr.msra.gmra.mxu1 %vm311_vm3, %v1813_v45  ;;  %v2288_v45 = vld [vmem:[#allocation13 + $0x10] sm:$0xff] }
0x20b9   :  { %2938 = vmatpush3.msra.mxu1 %v3671_v37  ;;  %2945 = vmatprep.mubr.msk.f32.mxu1 %vm3323_vm0, %v3322_v0  ;;  %v1289_v37 = vadd.f32 %v3763_v46, %v3719_v51  ;;  %v2605_v51 = vld [vmem:[%s3896_s9] ss:$0 sm:$0xff] }
0x20ba   :  { %2939 = vmatprep.subr.mxu1 %v3322_v0 }
0x20bb   :  { %2940 = vmatpush3.msra.mxu1 %v3674_v38 }
0x20bc   :  { %2941 = vmatprep.subr.mxu1 %v3322_v0 }
0x20bd   :  { %2942 = vmatpush3.msra.mxu1 %v3678_v39 }
0x20be   :  { %2943 = vmatprep.subr.mxu1 %v3322_v0 }
0x20bf   :  { %2944 = vmatpush3.msra.mxu1 %v3682_v40 }
0x20c0   :  { %2964 = vmatprep.subr.mxu1 %v3322_v0 }
0x2178   :  { %v1882_v47 = vpop.f32.mrf.mxu1 }
0x2179   :  { %v1886_v50 = vadd.f32 %v1882_v47, %v1289_v37  ;;  %v2285_v37 = vld [vmem:[#allocation12 + $0x18] sm:$0xff]  ;;  %v2284_v47 = vld [vmem:[#allocation12 + $0x10] sm:$0xff] }
0x217a   :  { %v2925_v52 = vpop.f32.mrf.mxu1 }
0x217b   :  { %3115 = vtanh.f32 %v1886_v50  ;;  %v2600_v38 = vmul.f32 -1.442695, %v1886_v50  ;;  %v2287_v50 = vld [vmem:[#allocation13 + $0x8] sm:$0xff] }
0x217c   :  { %v2283_v52 = vld [vmem:[#allocation12 + $0x8] sm:$0xff] }
0x217d   :  { %3117 = vpow2.f32 %v2600_v38  ;;  %v2282_v38 = vld [vmem:[#allocation12] sm:$0xff] }
0x2188   :  { %v3116_v53 = vpop.eup %3115 }
0x2189   :  { %1896 = vrot.lane.b32.xlu0 %v3116_v53, %s3324_s23  ;;  %v2286_v53 = vld [vmem:[#allocation13] sm:$0xff] }
0x218a   :  { %v3118_v54 = vpop.eup %3117 }
0x218b   :  { %v1890_v39 = vadd.f32 1.0, %v3118_v54 }
0x218d   :  { %3119 = vrcp.f32 %v1890_v39  ;;  %v2607_v39 = vld [vmem:[%s3898_s11] ss:$0 sm:$0xff] }
0x219a   :  { %v3120_v2 = vpop.eup %3119 }
0x219b   :  { %v1894_v9 = vmul.f32 %v3120_v2, %v1803_v41 }
0x21fb   :  { %v1897_v56 = vpop.permute.xlu0 %1896 }
0x21fc   :  { %v1899_v40 = vmul.f32 %v3120_v2, %v1897_v56 }
0x21fe   :  { %1901 = vrot.lane.b32.xlu1 %v1899_v40, %s3325_s4 }
0x2270   :  { %v1902_v57 = vpop.permute.xlu1 %1901 }
0x2271   :  { %v1904_v46 = vadd.f32 %v1902_v57, %v1894_v9 }
0x2273   :  { %3121 = vtanh.f32 %v1904_v46 }
0x2280   :  { %v3122_v59 = vpop.eup %3121 }
0x2281   :  { %1907 = vrot.lane.b32.xlu0 %v3122_v59, %s3324_s23 }
0x22f3   :  { %v1908_v60 = vpop.permute.xlu0 %1907 }
0x22f4   :  { %v1910_v61 = vmul.f32 %v3120_v2, %v1908_v60 }
0x22f6   :  { %1913 = vrot.lane.b32.xlu1 %v1910_v61, %s3325_s4 }
0x2368   :  { %v1914_v5 = vpop.permute.xlu1 %1913 }
0x2369   :  { %2935 = vmatmul.mubr.msk.f32.vlgmr.msra.gmra.mxu0 %vm311_vm3, %v1914_v5  ;;  %v2450_v5 = vld [vmem:[#allocation15 + $0x18] sm:$0xff] }
0x236a   :  { %2950 = vmatprep.mubr.msk.f32.mxu0 %vm3323_vm0, %v3322_v0  ;;  %2949 = vmatpush3.msra.mxu0 %v2114_v18 }
0x236b   :  { %2953 = vmatprep.subr.mxu0 %v3322_v0 }
0x236d   :  { %2951 = vmatmul.mubr.msk.f32.vlgmr.msra.gmra.mxu0 %vm2122_vm4, %v2113_v19 }
0x236e   :  { %2961 = vmatprep.mubr.msk.f32.mxu0 %vm3323_vm0, %v3322_v0  ;;  %2954 = vmatpush3.msra.mxu0 %v2200_v31 }
0x236f   :  { %2955 = vmatprep.subr.mxu0 %v3322_v0 }
0x2370   :  { %2956 = vmatpush3.msra.mxu0 %v2199_v32 }
0x2371   :  { %2957 = vmatprep.subr.mxu0 %v3322_v0 }
0x2372   :  { %2958 = vmatpush3.msra.mxu0 %v2198_v35 }
0x2373   :  { %2959 = vmatprep.subr.mxu0 %v3322_v0 }
0x2374   :  { %2960 = vmatpush3.msra.mxu0 %v2197_v36 }
0x2375   :  { %2975 = vmatprep.subr.mxu0 %v3322_v0 }
0x2429   :  { %v1983_v6 = vpop.f32.mrf.mxu0 }
0x242a   :  { %v1987_v63 = vadd.f32 %v1983_v6, %v1294_v62  ;;  %v2449_v62 = vld [vmem:[#allocation15 + $0x10] sm:$0xff]  ;;  %v2448_v6 = vld [vmem:[#allocation15 + $0x8] sm:$0xff] }
0x242b   :  { %v2936_v1 = vpop.f32.mrf.mxu0 }
0x242c   :  { %3123 = vtanh.f32 %v1987_v63  ;;  %v2602_v3 = vmul.f32 -1.442695, %v1987_v63  ;;  %v2447_v63 = vld [vmem:[#allocation15] sm:$0xff] }
0x242d   :  { %v2192_v48 = vpop.f32.mrf.mxu0 }
0x242e   :  { %3125 = vpow2.f32 %v2602_v3  ;;  %v2193_v33 = vadd.f32 %v2605_v51, %v2192_v48 }
0x242f   :  { %v2952_v34 = vpop.f32.mrf.mxu0 }
0x2430   :  { %v2196_v58 = vmax.f32 %v2193_v33, 0.0 }
0x2432   :  { %2962 = vmatmul.mubr.msk.f32.vlgmr.msra.gmra.mxu0 %vm311_vm3, %v2196_v58 }
0x2433   :  { %2983 = vmatprep.mubr.msk.f32.mxu0 %vm3323_vm0, %v3322_v0  ;;  %2976 = vmatpush3.msra.mxu0 %v2285_v37 }
0x2434   :  { %2977 = vmatprep.subr.mxu0 %v3322_v0 }
0x2435   :  { %2978 = vmatpush3.msra.mxu0 %v2284_v47 }
0x2436   :  { %2979 = vmatprep.subr.mxu0 %v3322_v0 }
0x2437   :  { %2980 = vmatpush3.msra.mxu0 %v2283_v52 }
0x2438   :  { %2981 = vmatprep.subr.mxu0 %v3322_v0 }
0x2439   :  { %v3124_v7 = vpop.eup %3123  ;;  %2982 = vmatpush3.msra.mxu0 %v2282_v38 }
0x243a   :  { %1997 = vrot.lane.b32.xlu0 %v3124_v7, %s3324_s23  ;;  %v2611_v7 = vld [vmem:[%s3901_s14] ss:$0 sm:$0xff]  ;;  %s2544_s14 = sshll.u32 %s3326_s27, 4  ;;  %s2545_s14 = int_to_ptr.vmem [resolvable:$true] %s2544_s14 }
0x243b   :  { %v3126_v4 = vpop.eup %3125  ;;  %s3283_s10 = scalar_lea.vmem %s2545_s14, 128  ;;  %p3288_p8 = scmp.lt.s32.totalorder %s2545_s14, %s2545_s14 }
0x243c   :  { %v1991_v55 = vadd.f32 1.0, %v3126_v4  ;;  %p3284_p7 = scmp.ne.s32.totalorder %s2545_s14, %s3283_s10  ;;  %p3289_p9 = scmp.lt.s32.totalorder %s3283_s10, %s3283_s10 }
0x243e   :  { %3127 = vrcp.f32 %v1991_v55  ;;  %p3290_p10 = por %p3289_p9, %p3288_p8 }
0x2440   :  { %p3291_p11 = pnand %p3290_p10, %p3284_p7 }
0x244b   :  { %v3128_v8 = vpop.eup %3127 }
0x244c   :  { %v1995_v12 = vmul.f32 %v3128_v8, %v1904_v46 }
0x24ac   :  { %v1998_v10 = vpop.permute.xlu0 %1997 }
0x24ad   :  { %v2000_v11 = vmul.f32 %v3128_v8, %v1998_v10  ;;  %v2612_v10 = vld [vmem:[%s3903_s16] ss:$0 sm:$0xff] }
0x24af   :  { %2002 = vrot.lane.b32.xlu1 %v2000_v11, %s3325_s4 }
0x24f2   :  { %v2277_v2 = vpop.f32.mrf.mxu0 }
0x24f3   :  { %v2278_v56 = vadd.f32 %v2607_v39, %v2277_v2 }
0x24f4   :  { %v2963_v40 = vpop.f32.mrf.mxu0 }
0x24f5   :  { %v2281_v9 = vmax.f32 %v2278_v56, 0.0 }
0x2521   :  { %v2003_v13 = vpop.permute.xlu1 %2002 }
0x2522   :  { %v2005_v49 = vadd.f32 %v2003_v13, %v1995_v12 }
0x2524   :  { %3129 = vtanh.f32 %v2005_v49 }
0x2531   :  { %v3130_v14 = vpop.eup %3129 }
0x2532   :  { %2008 = vrot.lane.b32.xlu0 %v3130_v14, %s3324_s23 }
0x25a4   :  { %v2009_v15 = vpop.permute.xlu0 %2008 }
0x25a5   :  { %v2011_v16 = vmul.f32 %v3128_v8, %v2009_v15 }
0x25a7   :  { %2014 = vrot.lane.b32.xlu1 %v2011_v16, %s3325_s4 }
0x2619   :  { %v2015_v17 = vpop.permute.xlu1 %2014 }
0x261a   :  { %2946 = vmatmul.mubr.msk.f32.vlgmr.msra.gmra.mxu1 %vm311_vm3, %v2015_v17 }
0x261b   :  { %2972 = vmatprep.mubr.msk.f32.mxu1 %vm3323_vm0, %v3322_v0  ;;  %2965 = vmatpush3.msra.mxu1 %v2289_v44 }
0x261c   :  { %2966 = vmatprep.subr.mxu1 %v3322_v0 }
0x261d   :  { %2967 = vmatpush3.msra.mxu1 %v2288_v45 }
0x261e   :  { %2968 = vmatprep.subr.mxu1 %v3322_v0 }
0x261f   :  { %2969 = vmatpush3.msra.mxu1 %v2287_v50 }
0x2620   :  { %2970 = vmatprep.subr.mxu1 %v3322_v0 }
0x2621   :  { %2971 = vmatpush3.msra.mxu1 %v2286_v53 }
0x2622   :  { %2986 = vmatprep.subr.mxu1 %v3322_v0  ;;  %2973 = vmatmul.mubr.msk.f32.vlgmr.msra.gmra.mxu1 %vm311_vm3, %v2281_v9 }
0x2623   :  { %2994 = vmatprep.mubr.msk.f32.mxu1 %vm3323_vm0, %v3322_v0  ;;  %2987 = vmatpush3.msra.mxu1 %v2450_v5 }
0x2624   :  { %2988 = vmatprep.subr.mxu1 %v3322_v0 }
0x2625   :  { %2989 = vmatpush3.msra.mxu1 %v2449_v62 }
0x2626   :  { %2990 = vmatprep.subr.mxu1 %v3322_v0 }
0x2627   :  { %2991 = vmatpush3.msra.mxu1 %v2448_v6 }
0x2628   :  { %2992 = vmatprep.subr.mxu1 %v3322_v0 }
0x2629   :  { %2993 = vmatpush3.msra.mxu1 %v2447_v63 }
0x26da   :  { %v2084_v21 = vpop.f32.mrf.mxu1 }
0x26db   :  { %v2088_v22 = vadd.f32 %v2084_v21, %v1299_v20 }
0x26dc   :  { %v2947_v23 = vpop.f32.mrf.mxu1 }
0x26dd   :  { %3131 = vtanh.f32 %v2088_v22  ;;  %v2604_v25 = vmul.f32 -1.442695, %v2088_v22 }
0x26df   :  { %3133 = vpow2.f32 %v2604_v25 }
0x26e2   :  { %v2359_v60 = vpop.f32.mrf.mxu1 }
0x26e4   :  { %v2974_v61 = vpop.f32.mrf.mxu1 }
0x26ea   :  { %v3132_v24 = vpop.eup %3131 }
0x26eb   :  { %2098 = vrot.lane.b32.xlu0 %v3132_v24, %s3324_s23 }
0x26ec   :  { %v3134_v26 = vpop.eup %3133 }
0x26ed   :  { %v2092_v27 = vadd.f32 1.0, %v3134_v26 }
0x26ef   :  { %3135 = vrcp.f32 %v2092_v27 }
0x26fc   :  { %v3136_v28 = vpop.eup %3135 }
0x26fd   :  { %v2096_v41 = vmul.f32 %v3136_v28, %v2005_v49 }
0x275d   :  { %v2099_v29 = vpop.permute.xlu0 %2098 }
0x275e   :  { %v2101_v30 = vmul.f32 %v3136_v28, %v2099_v29 }
0x2760   :  { %2103 = vrot.lane.b32.xlu1 %v2101_v30, %s3325_s4 }
0x27d2   :  { %v2104_v42 = vpop.permute.xlu1 %2103 }
0x27d3   :  { %v2106_v43 = vadd.f32 %v2104_v42, %v2096_v41 }
0x27d5   :  { %3137 = vtanh.f32 %v2106_v43 }
0x27e2   :  { %v3138_v54 = vpop.eup %3137 }
0x27e3   :  { %2109 = vrot.lane.b32.xlu0 %v3138_v54, %s3324_s23 }
0x2855   :  { %v2110_v57 = vpop.permute.xlu0 %2109 }
0x2856   :  { %v2112_v46 = vmul.f32 %v3136_v28, %v2110_v57 }
0x2858   :  { %2364 = vrot.lane.b32.xlu1 %v2112_v46, %s3325_s4 }
0x28ca   :  { %v2365_v59 = vpop.permute.xlu1 %2364 }
0x28cb   :  { %2984 = vmatmul.mubr.msk.f32.vlgmr.msra.gmra.mxu0 %vm311_vm3, %v2365_v59 }
0x298b   :  { %v2434_v1 = vpop.f32.mrf.mxu0 }
0x298c   :  { %v2435_v3 = vadd.f32 %v2434_v1, %v2359_v60 }
0x298d   :  { %v2985_v4 = vpop.f32.mrf.mxu0 }
0x298e   :  { %v2445_v55 = vadd.f32 %v2611_v7, %v2435_v3 }
0x2990   :  { %v2446_v8 = vmax.f32 %v2445_v55, 0.0 }
0x2992   :  { %2995 = vmatmul.mubr.msk.f32.vlgmr.msra.gmra.mxu1 %vm311_vm3, %v2446_v8 }
0x2a52   :  { %v2527_v11 = vpop.f32.mrf.mxu1 }
0x2a53   :  { %v2528_v12 = vadd.f32 %v2612_v10, %v2527_v11 }
0x2a54   :  { %v2996_v0 = vpop.f32.mrf.mxu1 }
0x2a55   :  { %v2614_v13 = vmul.f32 -1.442695, %v2528_v12 }
0x2a57   :  { %3139 = vpow2.f32 %v2614_v13 }
0x2a64   :  { %v3140_v49 = vpop.eup %3139 }
0x2a65   :  { %v2534_v14 = vadd.f32 1.0, %v3140_v49 }
0x2a67   :  { %3141 = vrcp.f32 %v2534_v14 }
0x2a74   :  { %v3142_v15 = vpop.eup %3141 }
0x2a75   :  { %2537 = vst [vmem:[#allocation16] sm:$0xff] %v3142_v15 }
0x2a76   :  { %3294 = shalt.err (!%p3291_p11)
}
0x2a77   :  { %2547 = dma.vmem_to_hbm [thread:$0]  %s2545_s14, 128, %s3904_s17, [#allocation6]  }
0x2a78   :  { %3311 = dma.done.wait [#allocation6], 128  }
0x2a79   :  { %3312 = vsyncadd [#allocation6], 4294967168 }
0x2a7a   :  { %2551 = vsyncpa [#allocation5], 1 }
0x2a7b   :  { %2552 = vsyncpa [#allocation8], 1 }
0x2a7c   :  { %2553 = vsyncpa [#allocation11], 1 }
0x2a7d   :  { %2554 = vsyncpa [#allocation14], 1 }
0x2a7e   :  { %2555 = vsyncpa [#allocation6], 1 }

</bundles_post_ra>
